<compile_context>
chip_gen: v5e
topology: v5e:2x2
jax: 0.10.0
libtpu: 0.0.40
codegen_flags: <defaults>
</compile_context>

<pallas_src>
import math
from functools import partial

import numpy as np
import jax
import jax.numpy as jnp
from jax.experimental import pallas as pl
from jax.experimental.pallas import tpu as pltpu


_EPS = 1e-5                 # nn.BatchNorm1d default
_TARGET_ROWS = 1024         # graphs*nodes rows per grid step (review: 1024-2048)
_NEG_INF = -1e30

_vmem_cache = [None]


def _vmem_limit_bytes():
    """75% of physical VMEM, capped at 96 MiB (=> <=48 MiB on v7x, 96 MiB on v5e/v6e)."""
    if _vmem_cache[0] is None:
        limit = 48 * 1024 * 1024           # safe fallback on every generation
        try:
            info_fn = getattr(pltpu, "get_tpu_info", None)
            if info_fn is not None:
                cap = int(info_fn().vmem_capacity_bytes)
                limit = min((cap * 3) // 4, 96 * 1024 * 1024)
        except Exception:
            pass
        _vmem_cache[0] = limit
    return _vmem_cache[0]


def _compiler_params():
    return pltpu.CompilerParams(dimension_semantics=("parallel",),
                                vmem_limit_bytes=_vmem_limit_bytes())


def _round_up(x, m):
    return (x + m - 1) // m * m


def _choose_tiling(B, Gp, target_rows=_TARGET_ROWS):
    """Batch tile TB (graphs per grid step), number of tiles NT, padded batch Bp."""
    tb = max(1, min(B, target_rows // Gp))
    if B >= 2:
        tb = min(tb, (B + 1) // 2)         # >=2 grid steps so both v7x TCs are fed
    nt = -(-B // tb)
    return tb, nt, nt * tb


def _const_spec(shape):
    # Grid-invariant block (whole array every step).
    # TODO(synk): mark with pipeline_mode=pl.Buffered(1) to drop the redundant second
    # buffer of these constant-index weight blocks (v7x VMEM) once that path is stable.
    zeros = (0,) * len(shape)
    return pl.BlockSpec(tuple(shape), lambda i, _z=zeros: _z)


def _tile_spec(TB, Gp, D):
    return pl.BlockSpec((TB, Gp, D), lambda i: (i, 0, 0))


def _nbytes(a):
    return int(np.prod(a.shape)) * np.dtype(a.dtype).itemsize


def _mm(a_f32, w_bf16):
    """bf16 MXU matmul with f32 accumulation (weights already bf16)."""
    return jnp.dot(a_f32.astype(jnp.bfloat16), w_bf16,
                   preferred_element_type=jnp.float32)


# --------------------------- in-kernel helpers ---------------------------

def _masked_row_stats(x2d, *, TB, Gp, G_real, B_real, pad_b, pad_g):
    """(M, D) -> (1, 2, D): per-feature sum / sum-of-squares over VALID rows only."""
    D = x2d.shape[-1]
    if pad_b or pad_g:
        b_idx = (jax.lax.broadcasted_iota(jnp.int32, (TB, Gp), 0)
                 + pl.program_id(0) * TB)
        g_idx = jax.lax.broadcasted_iota(jnp.int32, (TB, Gp), 1)
        m = jnp.logical_and(b_idx < B_real, g_idx < G_real)
        m = m.astype(jnp.float32).reshape(TB * Gp, 1)
        xm = x2d * m
        s1 = jnp.sum(xm, axis=0, keepdims=True)
        s2 = jnp.sum(xm * x2d, axis=0, keepdims=True)
    else:
        s1 = jnp.sum(x2d, axis=0, keepdims=True)
        s2 = jnp.sum(x2d * x2d, axis=0, keepdims=True)
    return jnp.concatenate([s1, s2], axis=0).reshape(1, 2, D)


# ------------------------------ Pallas kernels ------------------------------

def _attn_layer_kernel(*refs, mode, TB, Gp, G_real, B_real, H, dk, pad_b, pad_g):
    """[embed | BN(prev) | identity] -> fused-head MHA -> +residual -> partial stats."""
    if mode == "embed":
        x_ref, we_ref, be_ref, wqkv_ref, wo_ref, h1_ref, st_ref = refs
        nd = x_ref.shape[-1]
        x2 = x_ref[...].astype(jnp.float32).reshape(TB * Gp, nd)
        # tiny contraction; keep the input embedding in f32 (essentially free)
        h = jnp.dot(x2, we_ref[...], preferred_element_type=jnp.float32) + be_ref[...]
    elif mode == "prenorm":
        hin_ref, sc_ref, sh_ref, wqkv_ref, wo_ref, h1_ref, st_ref = refs
        x2 = hin_ref[...].astype(jnp.float32).reshape(TB * Gp, hin_ref.shape[-1])
        h = x2 * sc_ref[...] + sh_ref[...]            # BN2 of previous layer
    else:                                             # "plain": first layer, no embed
        hin_ref, wqkv_ref, wo_ref, h1_ref, st_ref = refs
        h = hin_ref[...].astype(jnp.float32).reshape(TB * Gp, hin_ref.shape[-1])

    D = wo_ref.shape[-1]
    HK = H * dk
    M = TB * Gp

    # Fused Q|K|V projection: one (M, D) x (D, 3*H*dk) bf16 matmul; 1/sqrt(dk)
    # already folded into the Wq columns host-side.
    qkv = _mm(h, wqkv_ref[...])                       # (M, 3*HK) f32
    qkv3 = qkv.astype(jnp.bfloat16).reshape(TB, Gp, 3 * HK)   # free view (Gp % 8 == 0)
    wo = wo_ref[...]                                  # (H, dv, D) bf16

    if pad_g:
        kmask = jax.lax.broadcasted_iota(jnp.int32, (1, 1, Gp), 2) < G_real

    out = jnp.zeros((M, D), jnp.float32)
    for hh in range(H):                               # heads: batched rank-3 einsums
        qh = qkv3[:, :, hh * dk:(hh + 1) * dk]                       # (TB, Gp, dk)
        kh = qkv3[:, :, HK + hh * dk:HK + (hh + 1) * dk]
        vh = qkv3[:, :, 2 * HK + hh * dk:2 * HK + (hh + 1) * dk]
        s = jnp.einsum("bqd,bkd->bqk", qh, kh,
                       preferred_element_type=jnp.float32)           # (TB, Gp, Gp)
        if pad_g:
            s = jnp.where(kmask, s, _NEG_INF)          # padded keys contribute 0
        p = jnp.exp(s - jnp.max(s, axis=-1, keepdims=True))
        attn = p * pl.reciprocal(jnp.sum(p, axis=-1, keepdims=True), approx=True)
        hd = jnp.einsum("bqk,bkd->bqd", attn.astype(jnp.bfloat16), vh,
                        preferred_element_type=jnp.float32)          # (TB, Gp, dk)
        # output projection by per-head accumulation (no lane-axis concat)
        out = out + jnp.dot(hd.reshape(M, dk).astype(jnp.bfloat16), wo[hh],
                            preferred_element_type=jnp.float32)

    h1 = h + out                                       # skip connection
    h1_ref[...] = h1.reshape(TB, Gp, D).astype(h1_ref.dtype)
    st_ref[...] = _masked_row_stats(h1, TB=TB, Gp=Gp, G_real=G_real,
                                    B_real=B_real, pad_b=pad_b, pad_g=pad_g)


def _ffn_layer_kernel(h1_ref, sc_ref, sh_ref, w1_ref, b1_ref, w2_ref, b2_ref,
                      h2_ref, st_ref, *, TB, Gp, G_real, B_real, pad_b, pad_g):
    """BN1 (precomputed scale/shift) -> Linear/ReLU/Linear -> +residual -> stats."""
    D = h2_ref.shape[-1]
    x = h1_ref[...].astype(jnp.float32).reshape(TB * Gp, D)
    hn = x * sc_ref[...] + sh_ref[...]
    z = jnp.maximum(_mm(hn, w1_ref[...]) + b1_ref[...], 0.0)
    ff = _mm(z, w2_ref[...]) + b2_ref[...]
    h2 = hn + ff                                       # skip connection
    h2_ref[...] = h2.reshape(TB, Gp, D).astype(h2_ref.dtype)
    st_ref[...] = _masked_row_stats(h2, TB=TB, Gp=Gp, G_real=G_real,
                                    B_real=B_real, pad_b=pad_b, pad_g=pad_g)


def _final_bn_mean_kernel(h2_ref, sc_ref, sh_ref, ho_ref, hm_ref,
                          *, TB, Gp, G_real, pad_g):
    """Final BN2 + per-graph mean fused into the same pass."""
    D = ho_ref.shape[-1]
    x = h2_ref[...].astype(jnp.float32).reshape(TB * Gp, D)
    hn = x * sc_ref[...] + sh_ref[...]
    h3 = hn.reshape(TB, Gp, D)
    ho_ref[...] = h3.astype(ho_ref.dtype)
    if pad_g:
        gm = (jax.lax.broadcasted_iota(jnp.int32, (1, Gp, 1), 1) < G_real)
        hm_ref[...] = (jnp.sum(h3 * gm.astype(jnp.float32), axis=1, keepdims=True)
                       * (1.0 / G_real))
    else:
        hm_ref[...] = jnp.mean(h3, axis=1, keepdims=True)


# --------------------------- between-kernel (tiny XLA) ---------------------------

def _bn_scale_shift(partial_stats, gamma, beta, n_rows, eps=_EPS):
    """Reduce (NT, 2, D) partial stats to per-feature BN scale/shift (training mode)."""
    tot = jnp.sum(partial_stats, axis=0)               # (2, D)
    mean = tot[0] * (1.0 / n_rows)
    var = jnp.maximum(tot[1] * (1.0 / n_rows) - mean * mean, 0.0)   # biased variance
    inv = jax.lax.rsqrt(var + eps)
    scale = gamma.reshape(-1) * inv
    shift = beta.reshape(-1) - mean * scale
    D = scale.shape[0]
    return scale.reshape(1, D), shift.reshape(1, D)


# ------------------------------ pallas_call wrappers ------------------------------

def _attention_layer(h_in, layer, init_embed, prenorm, *, TB, NT, Gp, G, B):
    wqkv, wo = layer["wqkv"], layer["wo"]
    H, dk, D = int(wo.shape[0]), int(wo.shape[1]), int(wo.shape[2])
    Bp = h_in.shape[0]
    pad_b, pad_g = (Bp != B), (Gp != G)
    tile_in = _tile_spec(TB, Gp, h_in.shape[-1])

    if init_embed is not None:
        mode = "embed"
        we, be = init_embed
        inputs = (h_in, we, be, wqkv, wo)
        in_specs = [tile_in, _const_spec(we.shape), _const_spec(be.shape),
                    _const_spec(wqkv.shape), _const_spec(wo.shape)]
    elif prenorm is not None:
        mode = "prenorm"
        sc, sh = prenorm
        inputs = (h_in, sc, sh, wqkv, wo)
        in_specs = [tile_in, _const_spec(sc.shape), _const_spec(sh.shape),
                    _const_spec(wqkv.shape), _const_spec(wo.shape)]
    else:
        mode = "plain"
        inputs = (h_in, wqkv, wo)
        in_specs = [tile_in, _const_spec(wqkv.shape), _const_spec(wo.shape)]

    kernel = partial(_attn_layer_kernel, mode=mode, TB=TB, Gp=Gp, G_real=G,
                     B_real=B, H=H, dk=dk, pad_b=pad_b, pad_g=pad_g)

    M = Bp * Gp
    flops = (2 * M * h_in.shape[-1] * 3 * H * dk
             + 4 * Bp * H * Gp * Gp * dk + 2 * M * H * dk * D)
    trans = Bp * H * Gp * Gp
    bytes_acc = sum(_nbytes(a) for a in inputs) + M * D * 2 + NT * 2 * D * 4

    h1, st1 = pl.pallas_call(
        kernel,
        grid=(NT,),
        in_specs=in_specs,
        out_specs=[_tile_spec(TB, Gp, D),
                   pl.BlockSpec((1, 2, D), lambda i: (i, 0, 0))],
        out_shape=[jax.ShapeDtypeStruct((Bp, Gp, D), jnp.bfloat16),
                   jax.ShapeDtypeStruct((NT, 2, D), jnp.float32)],
        compiler_params=_compiler_params(),
        cost_estimate=pl.CostEstimate(flops=int(flops), transcendentals=int(trans),
                                      bytes_accessed=int(bytes_acc)),
    )(*inputs)
    return h1, st1


def _ffn_layer(h1, scale, shift, layer, *, TB, NT, Gp, G, B):
    w1, b1, w2, b2 = layer["w1"], layer["b1"], layer["w2"], layer["b2"]
    Bp, _, D = h1.shape
    F = w1.shape[1]
    pad_b, pad_g = (Bp != B), (Gp != G)
    kernel = partial(_ffn_layer_kernel, TB=TB, Gp=Gp, G_real=G, B_real=B,
                     pad_b=pad_b, pad_g=pad_g)
    M = Bp * Gp
    inputs = (h1, scale, shift, w1, b1, w2, b2)
    bytes_acc = sum(_nbytes(a) for a in inputs) + M * D * 2 + NT * 2 * D * 4

    h2, st2 = pl.pallas_call(
        kernel,
        grid=(NT,),
        in_specs=[_tile_spec(TB, Gp, D),
                  _const_spec(scale.shape), _const_spec(shift.shape),
                  _const_spec(w1.shape), _const_spec(b1.shape),
                  _const_spec(w2.shape), _const_spec(b2.shape)],
        out_specs=[_tile_spec(TB, Gp, D),
                   pl.BlockSpec((1, 2, D), lambda i: (i, 0, 0))],
        out_shape=[jax.ShapeDtypeStruct((Bp, Gp, D), jnp.bfloat16),
                   jax.ShapeDtypeStruct((NT, 2, D), jnp.float32)],
        compiler_params=_compiler_params(),
        cost_estimate=pl.CostEstimate(flops=int(4 * M * D * F + 8 * M * D),
                                      transcendentals=0,
                                      bytes_accessed=int(bytes_acc)),
    )(*inputs)
    return h2, st2


def _final_bn_mean(h2, scale, shift, *, TB, NT, Gp, G, B):
    Bp, _, D = h2.shape
    pad_g = Gp != G
    kernel = partial(_final_bn_mean_kernel, TB=TB, Gp=Gp, G_real=G, pad_g=pad_g)
    bytes_acc = _nbytes(h2) + 2 * D * 4 + Bp * Gp * D * 4 + Bp * D * 4

    h_out, h_mean = pl.pallas_call(
        kernel,
        grid=(NT,),
        in_specs=[_tile_spec(TB, Gp, D),
                  _const_spec(scale.shape), _const_spec(shift.shape)],
        out_specs=[_tile_spec(TB, Gp, D),
                   pl.BlockSpec((TB, 1, D), lambda i: (i, 0, 0))],
        out_shape=[jax.ShapeDtypeStruct((Bp, Gp, D), jnp.float32),
                   jax.ShapeDtypeStruct((Bp, 1, D), jnp.float32)],
        compiler_params=_compiler_params(),
        cost_estimate=pl.CostEstimate(flops=int(4 * Bp * Gp * D), transcendentals=0,
                                      bytes_accessed=int(bytes_acc)),
    )(h2, scale, shift)
    return h_out, h_mean


# --------------------------- parameter construction ---------------------------

def init_params(key, n_heads, embed_dim, n_layers, node_dim, feed_forward_hidden):
    """PyTorch-layout parameters with the same init distributions as the module."""
    val_dim = embed_dim // n_heads
    key_dim = val_dim

    def uniform(k, shape, stdv):
        return jax.random.uniform(k, shape, jnp.float32, -stdv, stdv)

    params = {}
    key, kw, kb = jax.random.split(key, 3)
    if node_dim is not None:
        stdv = 1.0 / math.sqrt(node_dim)
        params["init_embed"] = (uniform(kw, (node_dim, embed_dim), stdv),
                                uniform(kb, (1, embed_dim), stdv))
    else:
        params["init_embed"] = None

    layers = []
    for _ in range(n_layers):
        key, kq, kk, kv, ko, kw1, kb1, kw2, kb2 = jax.random.split(key, 9)
        layers.append({
            "mha": (uniform(kq, (n_heads, embed_dim, key_dim), 1.0 / math.sqrt(key_dim)),
                    uniform(kk, (n_heads, embed_dim, key_dim), 1.0 / math.sqrt(key_dim)),
                    uniform(kv, (n_heads, embed_dim, val_dim), 1.0 / math.sqrt(val_dim)),
                    uniform(ko, (n_heads, val_dim, embed_dim), 1.0 / math.sqrt(embed_dim))),
            "bn1": (jnp.ones((embed_dim,), jnp.float32),
                    jnp.zeros((embed_dim,), jnp.float32)),
            "ff": (uniform(kw1, (embed_dim, feed_forward_hidden), 1.0 / math.sqrt(embed_dim)),
                   uniform(kb1, (feed_forward_hidden,), 1.0 / math.sqrt(embed_dim)),
                   uniform(kw2, (feed_forward_hidden, embed_dim),
                           1.0 / math.sqrt(feed_forward_hidden)),
                   uniform(kb2, (embed_dim,), 1.0 / math.sqrt(feed_forward_hidden))),
            "bn2": (jnp.ones((embed_dim,), jnp.float32),
                    jnp.zeros((embed_dim,), jnp.float32)),
        })
    params["layers"] = layers
    return params


def fold_params(raw):
    """One-time preprocessing (outside jit): fold heads into (D, 3*H*dk), scale Wq by
    1/sqrt(dk), cast matmul weights to bf16.  Output pytree contains only arrays."""
    out = {"init_embed": None, "layers": []}
    if raw["init_embed"] is not None:
        we, be = raw["init_embed"]
        D_emb = we.shape[1]
        out["init_embed"] = (jnp.asarray(we, jnp.float32),
                             jnp.asarray(be, jnp.float32).reshape(1, D_emb))

    for layer in raw["layers"]:
        Wq, Wk, Wv, Wo = layer["mha"]                     # (H,D,dk) x3, (H,dv,D)
        H, D, dk = Wq.shape
        dv = Wv.shape[2]
        assert dk == dv
        nf = 1.0 / math.sqrt(dk)
        wq = jnp.transpose(Wq, (1, 0, 2)).reshape(D, H * dk) * nf   # norm factor folded
        wk = jnp.transpose(Wk, (1, 0, 2)).reshape(D, H * dk)
        wv = jnp.transpose(Wv, (1, 0, 2)).reshape(D, H * dv)
        wqkv = jnp.concatenate([wq, wk, wv], axis=1).astype(jnp.bfloat16)
        wo = jnp.asarray(Wo, jnp.bfloat16)                # keep (H, dv, D)
        g1, be1 = layer["bn1"]
        g2, be2 = layer["bn2"]
        w1, b1, w2, b2 = layer["ff"]
        F = w1.shape[1]
        out["layers"].append({
            "wqkv": wqkv, "wo": wo,
            "bn1_g": jnp.reshape(g1, (1, D)), "bn1_b": jnp.reshape(be1, (1, D)),
            "w1": jnp.asarray(w1, jnp.bfloat16), "b1": jnp.reshape(b1, (1, F)).astype(jnp.float32),
            "w2": jnp.asarray(w2, jnp.bfloat16), "b2": jnp.reshape(b2, (1, D)).astype(jnp.float32),
            "bn2_g": jnp.reshape(g2, (1, D)), "bn2_b": jnp.reshape(be2, (1, D)),
        })
    return out


# ------------------------------ forward pass ------------------------------

def graph_attention_encoder(params, x, mask=None):
    assert mask is None, "TODO mask not yet supported!"
    layers = params["layers"]
    init_embed = params["init_embed"]
    B, G = x.shape[0], x.shape[1]

    if not layers:
        # TODO(synk): degenerate n_layers == 0 path kept as plain JAX (no fusion win).
        if init_embed is not None:
            we, be = init_embed
            h = jnp.einsum("bgn,nd->bgd", x, we) + be.reshape(1, 1, -1)
        else:
            h = x
        return h, jnp.mean(h, axis=1)

    D = layers[0]["wo"].shape[-1]
    if init_embed is None:
        assert x.shape[-1] == D, "input feature dim must equal embed_dim when node_dim is None"

    Gp = _round_up(G, 8)                       # keep in-kernel reshapes as free views
    TB, NT, Bp = _choose_tiling(B, Gp)
    if Bp != B or Gp != G:
        x = jnp.pad(x, ((0, Bp - B), (0, Gp - G), (0, 0)))

    n_rows = float(B * G)                      # BN statistics over REAL rows only
    h = x
    prenorm = None
    for li, layer in enumerate(layers):
        emb = init_embed if li == 0 else None
        h1, st1 = _attention_layer(h, layer, emb, prenorm,
                                   TB=TB, NT=NT, Gp=Gp, G=G, B=B)
        sc1, sh1 = _bn_scale_shift(st1, layer["bn1_g"], layer["bn1_b"], n_rows)
        h, st2 = _ffn_layer(h1, sc1, sh1, layer, TB=TB, NT=NT, Gp=Gp, G=G, B=B)
        prenorm = _bn_scale_shift(st2, layer["bn2_g"], layer["bn2_b"], n_rows)

    # Last layer's BN2 + per-graph mean fused into a single final pass.
    h_out, h_mean = _final_bn_mean(h, prenorm[0], prenorm[1],
                                   TB=TB, NT=NT, Gp=Gp, G=G, B=B)
    return h_out[:B, :G, :], h_mean[:B, 0, :]


# ---------------------------------- main ----------------------------------

if __name__ == "__main__":
    n_heads = 4
    embed_dim = 32
    n_layers = 2
    node_dim = 4
    feed_forward_hidden = 64
    batch, graph_size = 2, 8

    key = jax.random.PRNGKey(0)
    k_params, k_x = jax.random.split(key)
    raw_params = init_params(k_params, n_heads, embed_dim, n_layers,
                             node_dim, feed_forward_hidden)
    params = fold_params(raw_params)           # one-time folding, outside jit
    x = jax.random.normal(k_x, (batch, graph_size, node_dim), jnp.float32)

    fwd = jax.jit(graph_attention_encoder)
    h, h_mean = fwd(params, x)
    jax.block_until_ready((h, h_mean))
    assert h.shape == (batch, graph_size, embed_dim)
    assert h_mean.shape == (batch, embed_dim)
    assert bool(jnp.all(jnp.isfinite(h))) and bool(jnp.all(jnp.isfinite(h_mean)))
    print("KERNEL_OK")
</pallas_src>

<mosaic_0001>
module attributes {stable_mosaic.version = 11 : i64} {
  func.func @_attn_layer_kernel(%arg0: i32, %arg1: memref<1x8x4xf32, #tpu.memory_space<vmem>>, %arg2: memref<4x32xf32, #tpu.memory_space<vmem>>, %arg3: memref<1x32xf32, #tpu.memory_space<vmem>>, %arg4: memref<32x96xbf16, #tpu.memory_space<vmem>>, %arg5: memref<4x8x32xbf16, #tpu.memory_space<vmem>>, %arg6: memref<1x8x32xbf16, #tpu.memory_space<vmem>>, %arg7: memref<1x2x32xf32, #tpu.memory_space<vmem>>) attributes {dimension_semantics = [#tpu.dimension_semantics<parallel>], iteration_bounds = array<i64: 2>, scalar_prefetch = 0 : i64, scratch_operands = 0 : i64, tpu.core_type = #tpu.core_type<tc>, window_params = [{transform_indices = @transform_0, window_bounds = array<i64: 1, 8, 4>}, {pipeline_mode = #tpu.pipeline_mode<synchronous>, transform_indices = @transform_1, window_bounds = array<i64: 4, 32>}, {pipeline_mode = #tpu.pipeline_mode<synchronous>, transform_indices = @transform_2, window_bounds = array<i64: 1, 32>}, {pipeline_mode = #tpu.pipeline_mode<synchronous>, transform_indices = @transform_3, window_bounds = array<i64: 32, 96>}, {pipeline_mode = #tpu.pipeline_mode<synchronous>, transform_indices = @transform_4, window_bounds = array<i64: 4, 8, 32>}, {transform_indices = @transform_5, window_bounds = array<i64: 1, 8, 32>}, {transform_indices = @transform_6, window_bounds = array<i64: 1, 2, 32>}]} {
    %c0 = arith.constant 0 : index
    %c0_0 = arith.constant 0 : index
    %c0_1 = arith.constant 0 : index
    %0 = vector.load %arg1[%c0, %c0_0, %c0_1] : memref<1x8x4xf32, #tpu.memory_space<vmem>>, vector<1x8x4xf32>
    %1 = vector.shape_cast %0 : vector<1x8x4xf32> to vector<8x4xf32>
    %c0_2 = arith.constant 0 : index
    %c0_3 = arith.constant 0 : index
    %2 = vector.load %arg2[%c0_2, %c0_3] : memref<4x32xf32, #tpu.memory_space<vmem>>, vector<4x32xf32>
    %cst = arith.constant dense<0.000000e+00> : vector<8x32xf32>
    %3 = tpu.matmul %1, %2, %cst {dimension_numbers = #tpu.dot_dimension_numbers<[1], [0], [0], [1], [0, 0, 1, 1], [], []>} : vector<8x4xf32>, vector<4x32xf32>, vector<8x32xf32> -> vector<8x32xf32>
    %c0_4 = arith.constant 0 : index
    %c0_5 = arith.constant 0 : index
    %4 = vector.load %arg3[%c0_4, %c0_5] : memref<1x32xf32, #tpu.memory_space<vmem>>, vector<1x32xf32>
    %5 = vector.broadcast %4 : vector<1x32xf32> to vector<8x32xf32>
    %6 = arith.addf %3, %5 : vector<8x32xf32>
    %c0_6 = arith.constant 0 : index
    %c0_7 = arith.constant 0 : index
    %7 = vector.load %arg4[%c0_6, %c0_7] : memref<32x96xbf16, #tpu.memory_space<vmem>>, vector<32x96xbf16>
    %8 = arith.truncf %6 : vector<8x32xf32> to vector<8x32xbf16>
    %cst_8 = arith.constant dense<0.000000e+00> : vector<8x96xf32>
    %9 = tpu.matmul %8, %7, %cst_8 {dimension_numbers = #tpu.dot_dimension_numbers<[1], [0], [0], [1], [0, 0, 1, 1], [], []>} : vector<8x32xbf16>, vector<32x96xbf16>, vector<8x96xf32> -> vector<8x96xf32>
    %10 = arith.truncf %9 : vector<8x96xf32> to vector<8x96xbf16>
    %11 = vector.shape_cast %10 : vector<8x96xbf16> to vector<1x8x96xbf16>
    %c0_9 = arith.constant 0 : index
    %c0_10 = arith.constant 0 : index
    %c0_11 = arith.constant 0 : index
    %12 = vector.load %arg5[%c0_9, %c0_10, %c0_11] : memref<4x8x32xbf16, #tpu.memory_space<vmem>>, vector<4x8x32xbf16>
    %cst_12 = arith.constant 0.000000e+00 : f32
    %13 = vector.broadcast %cst_12 : f32 to vector<8x32xf32>
    %14 = vector.extract_strided_slice %11 {offsets = [0, 0, 0], sizes = [1, 8, 8], strides = [1, 1, 1]} : vector<1x8x96xbf16> to vector<1x8x8xbf16>
    %15 = vector.extract_strided_slice %11 {offsets = [0, 0, 32], sizes = [1, 8, 8], strides = [1, 1, 1]} : vector<1x8x96xbf16> to vector<1x8x8xbf16>
    %16 = vector.extract_strided_slice %11 {offsets = [0, 0, 64], sizes = [1, 8, 8], strides = [1, 1, 1]} : vector<1x8x96xbf16> to vector<1x8x8xbf16>
    "tpu.trace_start"() <{level = 10 : i32, message = "bqd,bkd->bqk"}> : () -> ()
    %cst_13 = arith.constant dense<0.000000e+00> : vector<1x8x8xf32>
    %17 = tpu.matmul %14, %15, %cst_13 {dimension_numbers = #tpu.dot_dimension_numbers<[2], [2], [1], [1], [0, 0, 0, 1, 1, 1], [0], [0]>} : vector<1x8x8xbf16>, vector<1x8x8xbf16>, vector<1x8x8xf32> -> vector<1x8x8xf32>
    "tpu.trace_stop"() : () -> ()
    %cst_14 = arith.constant dense<0xFF800000> : vector<1x8xf32>
    %18 = vector.multi_reduction <maximumf>, %17, %cst_14 [2] : vector<1x8x8xf32> to vector<1x8xf32>
    %19 = vector.shape_cast %18 : vector<1x8xf32> to vector<1x8x1xf32>
    %20 = vector.broadcast %19 : vector<1x8x1xf32> to vector<1x8x8xf32>
    %21 = arith.subf %17, %20 : vector<1x8x8xf32>
    %22 = math.exp %21 : vector<1x8x8xf32>
    %cst_15 = arith.constant dense<0.000000e+00> : vector<1x8xf32>
    %23 = vector.multi_reduction <add>, %22, %cst_15 [2] : vector<1x8x8xf32> to vector<1x8xf32>
    %24 = vector.shape_cast %23 : vector<1x8xf32> to vector<1x8x1xf32>
    %25 = tpu.reciprocal %24 {approx = true} : vector<1x8x1xf32> -> vector<1x8x1xf32>
    %26 = vector.broadcast %25 : vector<1x8x1xf32> to vector<1x8x8xf32>
    %27 = arith.mulf %22, %26 : vector<1x8x8xf32>
    %28 = arith.truncf %27 : vector<1x8x8xf32> to vector<1x8x8xbf16>
    "tpu.trace_start"() <{level = 10 : i32, message = "bqk,bkd->bqd"}> : () -> ()
    %cst_16 = arith.constant dense<0.000000e+00> : vector<1x8x8xf32>
    %29 = tpu.matmul %28, %16, %cst_16 {dimension_numbers = #tpu.dot_dimension_numbers<[2], [1], [1], [2], [0, 0, 0, 1, 1, 2], [0], [0]>} : vector<1x8x8xbf16>, vector<1x8x8xbf16>, vector<1x8x8xf32> -> vector<1x8x8xf32>
    "tpu.trace_stop"() : () -> ()
    %30 = vector.shape_cast %29 : vector<1x8x8xf32> to vector<8x8xf32>
    %31 = arith.truncf %30 : vector<8x8xf32> to vector<8x8xbf16>
    %32 = vector.extract_strided_slice %12 {offsets = [0, 0, 0], sizes = [1, 8, 32], strides = [1, 1, 1]} : vector<4x8x32xbf16> to vector<1x8x32xbf16>
    %33 = vector.shape_cast %32 : vector<1x8x32xbf16> to vector<8x32xbf16>
    %cst_17 = arith.constant dense<0.000000e+00> : vector<8x32xf32>
    %34 = tpu.matmul %31, %33, %cst_17 {dimension_numbers = #tpu.dot_dimension_numbers<[1], [0], [0], [1], [0, 0, 1, 1], [], []>} : vector<8x8xbf16>, vector<8x32xbf16>, vector<8x32xf32> -> vector<8x32xf32>
    %35 = arith.addf %13, %34 : vector<8x32xf32>
    %36 = vector.extract_strided_slice %11 {offsets = [0, 0, 8], sizes = [1, 8, 8], strides = [1, 1, 1]} : vector<1x8x96xbf16> to vector<1x8x8xbf16>
    %37 = vector.extract_strided_slice %11 {offsets = [0, 0, 40], sizes = [1, 8, 8], strides = [1, 1, 1]} : vector<1x8x96xbf16> to vector<1x8x8xbf16>
    %38 = vector.extract_strided_slice %11 {offsets = [0, 0, 72], sizes = [1, 8, 8], strides = [1, 1, 1]} : vector<1x8x96xbf16> to vector<1x8x8xbf16>
    "tpu.trace_start"() <{level = 10 : i32, message = "bqd,bkd->bqk"}> : () -> ()
    %cst_18 = arith.constant dense<0.000000e+00> : vector<1x8x8xf32>
    %39 = tpu.matmul %36, %37, %cst_18 {dimension_numbers = #tpu.dot_dimension_numbers<[2], [2], [1], [1], [0, 0, 0, 1, 1, 1], [0], [0]>} : vector<1x8x8xbf16>, vector<1x8x8xbf16>, vector<1x8x8xf32> -> vector<1x8x8xf32>
    "tpu.trace_stop"() : () -> ()
    %cst_19 = arith.constant dense<0xFF800000> : vector<1x8xf32>
    %40 = vector.multi_reduction <maximumf>, %39, %cst_19 [2] : vector<1x8x8xf32> to vector<1x8xf32>
    %41 = vector.shape_cast %40 : vector<1x8xf32> to vector<1x8x1xf32>
    %42 = vector.broadcast %41 : vector<1x8x1xf32> to vector<1x8x8xf32>
    %43 = arith.subf %39, %42 : vector<1x8x8xf32>
    %44 = math.exp %43 : vector<1x8x8xf32>
    %cst_20 = arith.constant dense<0.000000e+00> : vector<1x8xf32>
    %45 = vector.multi_reduction <add>, %44, %cst_20 [2] : vector<1x8x8xf32> to vector<1x8xf32>
    %46 = vector.shape_cast %45 : vector<1x8xf32> to vector<1x8x1xf32>
    %47 = tpu.reciprocal %46 {approx = true} : vector<1x8x1xf32> -> vector<1x8x1xf32>
    %48 = vector.broadcast %47 : vector<1x8x1xf32> to vector<1x8x8xf32>
    %49 = arith.mulf %44, %48 : vector<1x8x8xf32>
    %50 = arith.truncf %49 : vector<1x8x8xf32> to vector<1x8x8xbf16>
    "tpu.trace_start"() <{level = 10 : i32, message = "bqk,bkd->bqd"}> : () -> ()
    %cst_21 = arith.constant dense<0.000000e+00> : vector<1x8x8xf32>
    %51 = tpu.matmul %50, %38, %cst_21 {dimension_numbers = #tpu.dot_dimension_numbers<[2], [1], [1], [2], [0, 0, 0, 1, 1, 2], [0], [0]>} : vector<1x8x8xbf16>, vector<1x8x8xbf16>, vector<1x8x8xf32> -> vector<1x8x8xf32>
    "tpu.trace_stop"() : () -> ()
    %52 = vector.shape_cast %51 : vector<1x8x8xf32> to vector<8x8xf32>
    %53 = arith.truncf %52 : vector<8x8xf32> to vector<8x8xbf16>
    %54 = vector.extract_strided_slice %12 {offsets = [1, 0, 0], sizes = [1, 8, 32], strides = [1, 1, 1]} : vector<4x8x32xbf16> to vector<1x8x32xbf16>
    %55 = vector.shape_cast %54 : vector<1x8x32xbf16> to vector<8x32xbf16>
    %cst_22 = arith.constant dense<0.000000e+00> : vector<8x32xf32>
    %56 = tpu.matmul %53, %55, %cst_22 {dimension_numbers = #tpu.dot_dimension_numbers<[1], [0], [0], [1], [0, 0, 1, 1], [], []>} : vector<8x8xbf16>, vector<8x32xbf16>, vector<8x32xf32> -> vector<8x32xf32>
    %57 = arith.addf %35, %56 : vector<8x32xf32>
    %58 = vector.extract_strided_slice %11 {offsets = [0, 0, 16], sizes = [1, 8, 8], strides = [1, 1, 1]} : vector<1x8x96xbf16> to vector<1x8x8xbf16>
    %59 = vector.extract_strided_slice %11 {offsets = [0, 0, 48], sizes = [1, 8, 8], strides = [1, 1, 1]} : vector<1x8x96xbf16> to vector<1x8x8xbf16>
    %60 = vector.extract_strided_slice %11 {offsets = [0, 0, 80], sizes = [1, 8, 8], strides = [1, 1, 1]} : vector<1x8x96xbf16> to vector<1x8x8xbf16>
    "tpu.trace_start"() <{level = 10 : i32, message = "bqd,bkd->bqk"}> : () -> ()
    %cst_23 = arith.constant dense<0.000000e+00> : vector<1x8x8xf32>
    %61 = tpu.matmul %58, %59, %cst_23 {dimension_numbers = #tpu.dot_dimension_numbers<[2], [2], [1], [1], [0, 0, 0, 1, 1, 1], [0], [0]>} : vector<1x8x8xbf16>, vector<1x8x8xbf16>, vector<1x8x8xf32> -> vector<1x8x8xf32>
    "tpu.trace_stop"() : () -> ()
    %cst_24 = arith.constant dense<0xFF800000> : vector<1x8xf32>
    %62 = vector.multi_reduction <maximumf>, %61, %cst_24 [2] : vector<1x8x8xf32> to vector<1x8xf32>
    %63 = vector.shape_cast %62 : vector<1x8xf32> to vector<1x8x1xf32>
    %64 = vector.broadcast %63 : vector<1x8x1xf32> to vector<1x8x8xf32>
    %65 = arith.subf %61, %64 : vector<1x8x8xf32>
    %66 = math.exp %65 : vector<1x8x8xf32>
    %cst_25 = arith.constant dense<0.000000e+00> : vector<1x8xf32>
    %67 = vector.multi_reduction <add>, %66, %cst_25 [2] : vector<1x8x8xf32> to vector<1x8xf32>
    %68 = vector.shape_cast %67 : vector<1x8xf32> to vector<1x8x1xf32>
    %69 = tpu.reciprocal %68 {approx = true} : vector<1x8x1xf32> -> vector<1x8x1xf32>
    %70 = vector.broadcast %69 : vector<1x8x1xf32> to vector<1x8x8xf32>
    %71 = arith.mulf %66, %70 : vector<1x8x8xf32>
    %72 = arith.truncf %71 : vector<1x8x8xf32> to vector<1x8x8xbf16>
    "tpu.trace_start"() <{level = 10 : i32, message = "bqk,bkd->bqd"}> : () -> ()
    %cst_26 = arith.constant dense<0.000000e+00> : vector<1x8x8xf32>
    %73 = tpu.matmul %72, %60, %cst_26 {dimension_numbers = #tpu.dot_dimension_numbers<[2], [1], [1], [2], [0, 0, 0, 1, 1, 2], [0], [0]>} : vector<1x8x8xbf16>, vector<1x8x8xbf16>, vector<1x8x8xf32> -> vector<1x8x8xf32>
    "tpu.trace_stop"() : () -> ()
    %74 = vector.shape_cast %73 : vector<1x8x8xf32> to vector<8x8xf32>
    %75 = arith.truncf %74 : vector<8x8xf32> to vector<8x8xbf16>
    %76 = vector.extract_strided_slice %12 {offsets = [2, 0, 0], sizes = [1, 8, 32], strides = [1, 1, 1]} : vector<4x8x32xbf16> to vector<1x8x32xbf16>
    %77 = vector.shape_cast %76 : vector<1x8x32xbf16> to vector<8x32xbf16>
    %cst_27 = arith.constant dense<0.000000e+00> : vector<8x32xf32>
    %78 = tpu.matmul %75, %77, %cst_27 {dimension_numbers = #tpu.dot_dimension_numbers<[1], [0], [0], [1], [0, 0, 1, 1], [], []>} : vector<8x8xbf16>, vector<8x32xbf16>, vector<8x32xf32> -> vector<8x32xf32>
    %79 = arith.addf %57, %78 : vector<8x32xf32>
    %80 = vector.extract_strided_slice %11 {offsets = [0, 0, 24], sizes = [1, 8, 8], strides = [1, 1, 1]} : vector<1x8x96xbf16> to vector<1x8x8xbf16>
    %81 = vector.extract_strided_slice %11 {offsets = [0, 0, 56], sizes = [1, 8, 8], strides = [1, 1, 1]} : vector<1x8x96xbf16> to vector<1x8x8xbf16>
    %82 = vector.extract_strided_slice %11 {offsets = [0, 0, 88], sizes = [1, 8, 8], strides = [1, 1, 1]} : vector<1x8x96xbf16> to vector<1x8x8xbf16>
    "tpu.trace_start"() <{level = 10 : i32, message = "bqd,bkd->bqk"}> : () -> ()
    %cst_28 = arith.constant dense<0.000000e+00> : vector<1x8x8xf32>
    %83 = tpu.matmul %80, %81, %cst_28 {dimension_numbers = #tpu.dot_dimension_numbers<[2], [2], [1], [1], [0, 0, 0, 1, 1, 1], [0], [0]>} : vector<1x8x8xbf16>, vector<1x8x8xbf16>, vector<1x8x8xf32> -> vector<1x8x8xf32>
    "tpu.trace_stop"() : () -> ()
    %cst_29 = arith.constant dense<0xFF800000> : vector<1x8xf32>
    %84 = vector.multi_reduction <maximumf>, %83, %cst_29 [2] : vector<1x8x8xf32> to vector<1x8xf32>
    %85 = vector.shape_cast %84 : vector<1x8xf32> to vector<1x8x1xf32>
    %86 = vector.broadcast %85 : vector<1x8x1xf32> to vector<1x8x8xf32>
    %87 = arith.subf %83, %86 : vector<1x8x8xf32>
    %88 = math.exp %87 : vector<1x8x8xf32>
    %cst_30 = arith.constant dense<0.000000e+00> : vector<1x8xf32>
    %89 = vector.multi_reduction <add>, %88, %cst_30 [2] : vector<1x8x8xf32> to vector<1x8xf32>
    %90 = vector.shape_cast %89 : vector<1x8xf32> to vector<1x8x1xf32>
    %91 = tpu.reciprocal %90 {approx = true} : vector<1x8x1xf32> -> vector<1x8x1xf32>
    %92 = vector.broadcast %91 : vector<1x8x1xf32> to vector<1x8x8xf32>
    %93 = arith.mulf %88, %92 : vector<1x8x8xf32>
    %94 = arith.truncf %93 : vector<1x8x8xf32> to vector<1x8x8xbf16>
    "tpu.trace_start"() <{level = 10 : i32, message = "bqk,bkd->bqd"}> : () -> ()
    %cst_31 = arith.constant dense<0.000000e+00> : vector<1x8x8xf32>
    %95 = tpu.matmul %94, %82, %cst_31 {dimension_numbers = #tpu.dot_dimension_numbers<[2], [1], [1], [2], [0, 0, 0, 1, 1, 2], [0], [0]>} : vector<1x8x8xbf16>, vector<1x8x8xbf16>, vector<1x8x8xf32> -> vector<1x8x8xf32>
    "tpu.trace_stop"() : () -> ()
    %96 = vector.shape_cast %95 : vector<1x8x8xf32> to vector<8x8xf32>
    %97 = arith.truncf %96 : vector<8x8xf32> to vector<8x8xbf16>
    %98 = vector.extract_strided_slice %12 {offsets = [3, 0, 0], sizes = [1, 8, 32], strides = [1, 1, 1]} : vector<4x8x32xbf16> to vector<1x8x32xbf16>
    %99 = vector.shape_cast %98 : vector<1x8x32xbf16> to vector<8x32xbf16>
    %cst_32 = arith.constant dense<0.000000e+00> : vector<8x32xf32>
    %100 = tpu.matmul %97, %99, %cst_32 {dimension_numbers = #tpu.dot_dimension_numbers<[1], [0], [0], [1], [0, 0, 1, 1], [], []>} : vector<8x8xbf16>, vector<8x32xbf16>, vector<8x32xf32> -> vector<8x32xf32>
    %101 = arith.addf %79, %100 : vector<8x32xf32>
    %102 = arith.addf %6, %101 : vector<8x32xf32>
    %103 = vector.shape_cast %102 : vector<8x32xf32> to vector<1x8x32xf32>
    %104 = arith.truncf %103 : vector<1x8x32xf32> to vector<1x8x32xbf16>
    %c0_33 = arith.constant 0 : index
    %c0_34 = arith.constant 0 : index
    %c0_35 = arith.constant 0 : index
    %105 = vector.load %arg6[%c0_33, %c0_34, %c0_35] : memref<1x8x32xbf16, #tpu.memory_space<vmem>>, vector<1x8x32xbf16>
    tpu.vector_store %arg6[%c0_33, %c0_34, %c0_35], %104 {strides = array<i32>} : memref<1x8x32xbf16, #tpu.memory_space<vmem>>, vector<1x8x32xbf16>,
    %cst_36 = arith.constant dense<0.000000e+00> : vector<32xf32>
    %106 = vector.multi_reduction <add>, %102, %cst_36 [0] : vector<8x32xf32> to vector<32xf32>
    %107 = vector.shape_cast %106 : vector<32xf32> to vector<1x32xf32>
    %108 = arith.mulf %102, %102 : vector<8x32xf32>
    %cst_37 = arith.constant dense<0.000000e+00> : vector<32xf32>
    %109 = vector.multi_reduction <add>, %108, %cst_37 [0] : vector<8x32xf32> to vector<32xf32>
    %110 = vector.shape_cast %109 : vector<32xf32> to vector<1x32xf32>
    %111 = tpu.concatenate %107, %110 in 0 : vector<1x32xf32>, vector<1x32xf32> -> vector<2x32xf32>
    %112 = vector.shape_cast %111 : vector<2x32xf32> to vector<1x2x32xf32>
    %c0_38 = arith.constant 0 : index
    %c0_39 = arith.constant 0 : index
    %c0_40 = arith.constant 0 : index
    %113 = vector.load %arg7[%c0_38, %c0_39, %c0_40] : memref<1x2x32xf32, #tpu.memory_space<vmem>>, vector<1x2x32xf32>
    tpu.vector_store %arg7[%c0_38, %c0_39, %c0_40], %112 {strides = array<i32>} : memref<1x2x32xf32, #tpu.memory_space<vmem>>, vector<1x2x32xf32>,
    return
  }
  func.func @transform_0(%arg0: i32) -> (i32, i32, i32) {
    %c0_i32 = arith.constant 0 : i32
    %c0_i32_0 = arith.constant 0 : i32
    %c0_i32_1 = arith.constant 0 : i32
    return %arg0, %c0_i32, %c0_i32_0 : i32, i32, i32
  }
  func.func @transform_1(%arg0: i32) -> (i32, i32) {
    %c0_i32 = arith.constant 0 : i32
    %c0_i32_0 = arith.constant 0 : i32
    %c0_i32_1 = arith.constant 0 : i32
    return %c0_i32, %c0_i32_0 : i32, i32
  }
  func.func @transform_2(%arg0: i32) -> (i32, i32) {
    %c0_i32 = arith.constant 0 : i32
    %c0_i32_0 = arith.constant 0 : i32
    %c0_i32_1 = arith.constant 0 : i32
    return %c0_i32, %c0_i32_0 : i32, i32
  }
  func.func @transform_3(%arg0: i32) -> (i32, i32) {
    %c0_i32 = arith.constant 0 : i32
    %c0_i32_0 = arith.constant 0 : i32
    %c0_i32_1 = arith.constant 0 : i32
    return %c0_i32, %c0_i32_0 : i32, i32
  }
  func.func @transform_4(%arg0: i32) -> (i32, i32, i32) {
    %c0_i32 = arith.constant 0 : i32
    %c0_i32_0 = arith.constant 0 : i32
    %c0_i32_1 = arith.constant 0 : i32
    %c0_i32_2 = arith.constant 0 : i32
    return %c0_i32, %c0_i32_0, %c0_i32_1 : i32, i32, i32
  }
  func.func @transform_5(%arg0: i32) -> (i32, i32, i32) {
    %c0_i32 = arith.constant 0 : i32
    %c0_i32_0 = arith.constant 0 : i32
    %c0_i32_1 = arith.constant 0 : i32
    return %arg0, %c0_i32, %c0_i32_0 : i32, i32, i32
  }
  func.func @transform_6(%arg0: i32) -> (i32, i32, i32) {
    %c0_i32 = arith.constant 0 : i32
    %c0_i32_0 = arith.constant 0 : i32
    %c0_i32_1 = arith.constant 0 : i32
    return %arg0, %c0_i32, %c0_i32_0 : i32, i32, i32
  }
}

module attributes {stable_mosaic.version = 11 : i64} {
  func.func @_attn_layer_kernel(%arg0: i32, %arg1: memref<1x8x32xbf16, #tpu.memory_space<vmem>>, %arg2: memref<1x32xf32, #tpu.memory_space<vmem>>, %arg3: memref<1x32xf32, #tpu.memory_space<vmem>>, %arg4: memref<32x96xbf16, #tpu.memory_space<vmem>>, %arg5: memref<4x8x32xbf16, #tpu.memory_space<vmem>>, %arg6: memref<1x8x32xbf16, #tpu.memory_space<vmem>>, %arg7: memref<1x2x32xf32, #tpu.memory_space<vmem>>) attributes {dimension_semantics = [#tpu.dimension_semantics<parallel>], iteration_bounds = array<i64: 2>, scalar_prefetch = 0 : i64, scratch_operands = 0 : i64, tpu.core_type = #tpu.core_type<tc>, window_params = [{transform_indices = @transform_0, window_bounds = array<i64: 1, 8, 32>}, {pipeline_mode = #tpu.pipeline_mode<synchronous>, transform_indices = @transform_1, window_bounds = array<i64: 1, 32>}, {pipeline_mode = #tpu.pipeline_mode<synchronous>, transform_indices = @transform_2, window_bounds = array<i64: 1, 32>}, {pipeline_mode = #tpu.pipeline_mode<synchronous>, transform_indices = @transform_3, window_bounds = array<i64: 32, 96>}, {pipeline_mode = #tpu.pipeline_mode<synchronous>, transform_indices = @transform_4, window_bounds = array<i64: 4, 8, 32>}, {transform_indices = @transform_5, window_bounds = array<i64: 1, 8, 32>}, {transform_indices = @transform_6, window_bounds = array<i64: 1, 2, 32>}]} {
    %c0 = arith.constant 0 : index
    %c0_0 = arith.constant 0 : index
    %c0_1 = arith.constant 0 : index
    %0 = vector.load %arg1[%c0, %c0_0, %c0_1] : memref<1x8x32xbf16, #tpu.memory_space<vmem>>, vector<1x8x32xbf16>
    %1 = arith.extf %0 : vector<1x8x32xbf16> to vector<1x8x32xf32>
    %2 = vector.shape_cast %1 : vector<1x8x32xf32> to vector<8x32xf32>
    %c0_2 = arith.constant 0 : index
    %c0_3 = arith.constant 0 : index
    %3 = vector.load %arg2[%c0_2, %c0_3] : memref<1x32xf32, #tpu.memory_space<vmem>>, vector<1x32xf32>
    %4 = vector.broadcast %3 : vector<1x32xf32> to vector<8x32xf32>
    %5 = arith.mulf %2, %4 : vector<8x32xf32>
    %c0_4 = arith.constant 0 : index
    %c0_5 = arith.constant 0 : index
    %6 = vector.load %arg3[%c0_4, %c0_5] : memref<1x32xf32, #tpu.memory_space<vmem>>, vector<1x32xf32>
    %7 = vector.broadcast %6 : vector<1x32xf32> to vector<8x32xf32>
    %8 = arith.addf %5, %7 : vector<8x32xf32>
    %c0_6 = arith.constant 0 : index
    %c0_7 = arith.constant 0 : index
    %9 = vector.load %arg4[%c0_6, %c0_7] : memref<32x96xbf16, #tpu.memory_space<vmem>>, vector<32x96xbf16>
    %10 = arith.truncf %8 : vector<8x32xf32> to vector<8x32xbf16>
    %cst = arith.constant dense<0.000000e+00> : vector<8x96xf32>
    %11 = tpu.matmul %10, %9, %cst {dimension_numbers = #tpu.dot_dimension_numbers<[1], [0], [0], [1], [0, 0, 1, 1], [], []>} : vector<8x32xbf16>, vector<32x96xbf16>, vector<8x96xf32> -> vector<8x96xf32>
    %12 = arith.truncf %11 : vector<8x96xf32> to vector<8x96xbf16>
    %13 = vector.shape_cast %12 : vector<8x96xbf16> to vector<1x8x96xbf16>
    %c0_8 = arith.constant 0 : index
    %c0_9 = arith.constant 0 : index
    %c0_10 = arith.constant 0 : index
    %14 = vector.load %arg5[%c0_8, %c0_9, %c0_10] : memref<4x8x32xbf16, #tpu.memory_space<vmem>>, vector<4x8x32xbf16>
    %cst_11 = arith.constant 0.000000e+00 : f32
    %15 = vector.broadcast %cst_11 : f32 to vector<8x32xf32>
    %16 = vector.extract_strided_slice %13 {offsets = [0, 0, 0], sizes = [1, 8, 8], strides = [1, 1, 1]} : vector<1x8x96xbf16> to vector<1x8x8xbf16>
    %17 = vector.extract_strided_slice %13 {offsets = [0, 0, 32], sizes = [1, 8, 8], strides = [1, 1, 1]} : vector<1x8x96xbf16> to vector<1x8x8xbf16>
    %18 = vector.extract_strided_slice %13 {offsets = [0, 0, 64], sizes = [1, 8, 8], strides = [1, 1, 1]} : vector<1x8x96xbf16> to vector<1x8x8xbf16>
    "tpu.trace_start"() <{level = 10 : i32, message = "bqd,bkd->bqk"}> : () -> ()
    %cst_12 = arith.constant dense<0.000000e+00> : vector<1x8x8xf32>
    %19 = tpu.matmul %16, %17, %cst_12 {dimension_numbers = #tpu.dot_dimension_numbers<[2], [2], [1], [1], [0, 0, 0, 1, 1, 1], [0], [0]>} : vector<1x8x8xbf16>, vector<1x8x8xbf16>, vector<1x8x8xf32> -> vector<1x8x8xf32>
    "tpu.trace_stop"() : () -> ()
    %cst_13 = arith.constant dense<0xFF800000> : vector<1x8xf32>
    %20 = vector.multi_reduction <maximumf>, %19, %cst_13 [2] : vector<1x8x8xf32> to vector<1x8xf32>
    %21 = vector.shape_cast %20 : vector<1x8xf32> to vector<1x8x1xf32>
    %22 = vector.broadcast %21 : vector<1x8x1xf32> to vector<1x8x8xf32>
    %23 = arith.subf %19, %22 : vector<1x8x8xf32>
    %24 = math.exp %23 : vector<1x8x8xf32>
    %cst_14 = arith.constant dense<0.000000e+00> : vector<1x8xf32>
    %25 = vector.multi_reduction <add>, %24, %cst_14 [2] : vector<1x8x8xf32> to vector<1x8xf32>
    %26 = vector.shape_cast %25 : vector<1x8xf32> to vector<1x8x1xf32>
    %27 = tpu.reciprocal %26 {approx = true} : vector<1x8x1xf32> -> vector<1x8x1xf32>
    %28 = vector.broadcast %27 : vector<1x8x1xf32> to vector<1x8x8xf32>
    %29 = arith.mulf %24, %28 : vector<1x8x8xf32>
    %30 = arith.truncf %29 : vector<1x8x8xf32> to vector<1x8x8xbf16>
    "tpu.trace_start"() <{level = 10 : i32, message = "bqk,bkd->bqd"}> : () -> ()
    %cst_15 = arith.constant dense<0.000000e+00> : vector<1x8x8xf32>
    %31 = tpu.matmul %30, %18, %cst_15 {dimension_numbers = #tpu.dot_dimension_numbers<[2], [1], [1], [2], [0, 0, 0, 1, 1, 2], [0], [0]>} : vector<1x8x8xbf16>, vector<1x8x8xbf16>, vector<1x8x8xf32> -> vector<1x8x8xf32>
    "tpu.trace_stop"() : () -> ()
    %32 = vector.shape_cast %31 : vector<1x8x8xf32> to vector<8x8xf32>
    %33 = arith.truncf %32 : vector<8x8xf32> to vector<8x8xbf16>
    %34 = vector.extract_strided_slice %14 {offsets = [0, 0, 0], sizes = [1, 8, 32], strides = [1, 1, 1]} : vector<4x8x32xbf16> to vector<1x8x32xbf16>
    %35 = vector.shape_cast %34 : vector<1x8x32xbf16> to vector<8x32xbf16>
    %cst_16 = arith.constant dense<0.000000e+00> : vector<8x32xf32>
    %36 = tpu.matmul %33, %35, %cst_16 {dimension_numbers = #tpu.dot_dimension_numbers<[1], [0], [0], [1], [0, 0, 1, 1], [], []>} : vector<8x8xbf16>, vector<8x32xbf16>, vector<8x32xf32> -> vector<8x32xf32>
    %37 = arith.addf %15, %36 : vector<8x32xf32>
    %38 = vector.extract_strided_slice %13 {offsets = [0, 0, 8], sizes = [1, 8, 8], strides = [1, 1, 1]} : vector<1x8x96xbf16> to vector<1x8x8xbf16>
    %39 = vector.extract_strided_slice %13 {offsets = [0, 0, 40], sizes = [1, 8, 8], strides = [1, 1, 1]} : vector<1x8x96xbf16> to vector<1x8x8xbf16>
    %40 = vector.extract_strided_slice %13 {offsets = [0, 0, 72], sizes = [1, 8, 8], strides = [1, 1, 1]} : vector<1x8x96xbf16> to vector<1x8x8xbf16>
    "tpu.trace_start"() <{level = 10 : i32, message = "bqd,bkd->bqk"}> : () -> ()
    %cst_17 = arith.constant dense<0.000000e+00> : vector<1x8x8xf32>
    %41 = tpu.matmul %38, %39, %cst_17 {dimension_numbers = #tpu.dot_dimension_numbers<[2], [2], [1], [1], [0, 0, 0, 1, 1, 1], [0], [0]>} : vector<1x8x8xbf16>, vector<1x8x8xbf16>, vector<1x8x8xf32> -> vector<1x8x8xf32>
    "tpu.trace_stop"() : () -> ()
    %cst_18 = arith.constant dense<0xFF800000> : vector<1x8xf32>
    %42 = vector.multi_reduction <maximumf>, %41, %cst_18 [2] : vector<1x8x8xf32> to vector<1x8xf32>
    %43 = vector.shape_cast %42 : vector<1x8xf32> to vector<1x8x1xf32>
    %44 = vector.broadcast %43 : vector<1x8x1xf32> to vector<1x8x8xf32>
    %45 = arith.subf %41, %44 : vector<1x8x8xf32>
    %46 = math.exp %45 : vector<1x8x8xf32>
    %cst_19 = arith.constant dense<0.000000e+00> : vector<1x8xf32>
    %47 = vector.multi_reduction <add>, %46, %cst_19 [2] : vector<1x8x8xf32> to vector<1x8xf32>
    %48 = vector.shape_cast %47 : vector<1x8xf32> to vector<1x8x1xf32>
    %49 = tpu.reciprocal %48 {approx = true} : vector<1x8x1xf32> -> vector<1x8x1xf32>
    %50 = vector.broadcast %49 : vector<1x8x1xf32> to vector<1x8x8xf32>
    %51 = arith.mulf %46, %50 : vector<1x8x8xf32>
    %52 = arith.truncf %51 : vector<1x8x8xf32> to vector<1x8x8xbf16>
    "tpu.trace_start"() <{level = 10 : i32, message = "bqk,bkd->bqd"}> : () -> ()
    %cst_20 = arith.constant dense<0.000000e+00> : vector<1x8x8xf32>
    %53 = tpu.matmul %52, %40, %cst_20 {dimension_numbers = #tpu.dot_dimension_numbers<[2], [1], [1], [2], [0, 0, 0, 1, 1, 2], [0], [0]>} : vector<1x8x8xbf16>, vector<1x8x8xbf16>, vector<1x8x8xf32> -> vector<1x8x8xf32>
    "tpu.trace_stop"() : () -> ()
    %54 = vector.shape_cast %53 : vector<1x8x8xf32> to vector<8x8xf32>
    %55 = arith.truncf %54 : vector<8x8xf32> to vector<8x8xbf16>
    %56 = vector.extract_strided_slice %14 {offsets = [1, 0, 0], sizes = [1, 8, 32], strides = [1, 1, 1]} : vector<4x8x32xbf16> to vector<1x8x32xbf16>
    %57 = vector.shape_cast %56 : vector<1x8x32xbf16> to vector<8x32xbf16>
    %cst_21 = arith.constant dense<0.000000e+00> : vector<8x32xf32>
    %58 = tpu.matmul %55, %57, %cst_21 {dimension_numbers = #tpu.dot_dimension_numbers<[1], [0], [0], [1], [0, 0, 1, 1], [], []>} : vector<8x8xbf16>, vector<8x32xbf16>, vector<8x32xf32> -> vector<8x32xf32>
    %59 = arith.addf %37, %58 : vector<8x32xf32>
    %60 = vector.extract_strided_slice %13 {offsets = [0, 0, 16], sizes = [1, 8, 8], strides = [1, 1, 1]} : vector<1x8x96xbf16> to vector<1x8x8xbf16>
    %61 = vector.extract_strided_slice %13 {offsets = [0, 0, 48], sizes = [1, 8, 8], strides = [1, 1, 1]} : vector<1x8x96xbf16> to vector<1x8x8xbf16>
    %62 = vector.extract_strided_slice %13 {offsets = [0, 0, 80], sizes = [1, 8, 8], strides = [1, 1, 1]} : vector<1x8x96xbf16> to vector<1x8x8xbf16>
    "tpu.trace_start"() <{level = 10 : i32, message = "bqd,bkd->bqk"}> : () -> ()
    %cst_22 = arith.constant dense<0.000000e+00> : vector<1x8x8xf32>
    %63 = tpu.matmul %60, %61, %cst_22 {dimension_numbers = #tpu.dot_dimension_numbers<[2], [2], [1], [1], [0, 0, 0, 1, 1, 1], [0], [0]>} : vector<1x8x8xbf16>, vector<1x8x8xbf16>, vector<1x8x8xf32> -> vector<1x8x8xf32>
    "tpu.trace_stop"() : () -> ()
    %cst_23 = arith.constant dense<0xFF800000> : vector<1x8xf32>
    %64 = vector.multi_reduction <maximumf>, %63, %cst_23 [2] : vector<1x8x8xf32> to vector<1x8xf32>
    %65 = vector.shape_cast %64 : vector<1x8xf32> to vector<1x8x1xf32>
    %66 = vector.broadcast %65 : vector<1x8x1xf32> to vector<1x8x8xf32>
    %67 = arith.subf %63, %66 : vector<1x8x8xf32>
    %68 = math.exp %67 : vector<1x8x8xf32>
    %cst_24 = arith.constant dense<0.000000e+00> : vector<1x8xf32>
    %69 = vector.multi_reduction <add>, %68, %cst_24 [2] : vector<1x8x8xf32> to vector<1x8xf32>
    %70 = vector.shape_cast %69 : vector<1x8xf32> to vector<1x8x1xf32>
    %71 = tpu.reciprocal %70 {approx = true} : vector<1x8x1xf32> -> vector<1x8x1xf32>
    %72 = vector.broadcast %71 : vector<1x8x1xf32> to vector<1x8x8xf32>
    %73 = arith.mulf %68, %72 : vector<1x8x8xf32>
    %74 = arith.truncf %73 : vector<1x8x8xf32> to vector<1x8x8xbf16>
    "tpu.trace_start"() <{level = 10 : i32, message = "bqk,bkd->bqd"}> : () -> ()
    %cst_25 = arith.constant dense<0.000000e+00> : vector<1x8x8xf32>
    %75 = tpu.matmul %74, %62, %cst_25 {dimension_numbers = #tpu.dot_dimension_numbers<[2], [1], [1], [2], [0, 0, 0, 1, 1, 2], [0], [0]>} : vector<1x8x8xbf16>, vector<1x8x8xbf16>, vector<1x8x8xf32> -> vector<1x8x8xf32>
    "tpu.trace_stop"() : () -> ()
    %76 = vector.shape_cast %75 : vector<1x8x8xf32> to vector<8x8xf32>
    %77 = arith.truncf %76 : vector<8x8xf32> to vector<8x8xbf16>
    %78 = vector.extract_strided_slice %14 {offsets = [2, 0, 0], sizes = [1, 8, 32], strides = [1, 1, 1]} : vector<4x8x32xbf16> to vector<1x8x32xbf16>
    %79 = vector.shape_cast %78 : vector<1x8x32xbf16> to vector<8x32xbf16>
    %cst_26 = arith.constant dense<0.000000e+00> : vector<8x32xf32>
    %80 = tpu.matmul %77, %79, %cst_26 {dimension_numbers = #tpu.dot_dimension_numbers<[1], [0], [0], [1], [0, 0, 1, 1], [], []>} : vector<8x8xbf16>, vector<8x32xbf16>, vector<8x32xf32> -> vector<8x32xf32>
    %81 = arith.addf %59, %80 : vector<8x32xf32>
    %82 = vector.extract_strided_slice %13 {offsets = [0, 0, 24], sizes = [1, 8, 8], strides = [1, 1, 1]} : vector<1x8x96xbf16> to vector<1x8x8xbf16>
    %83 = vector.extract_strided_slice %13 {offsets = [0, 0, 56], sizes = [1, 8, 8], strides = [1, 1, 1]} : vector<1x8x96xbf16> to vector<1x8x8xbf16>
    %84 = vector.extract_strided_slice %13 {offsets = [0, 0, 88], sizes = [1, 8, 8], strides = [1, 1, 1]} : vector<1x8x96xbf16> to vector<1x8x8xbf16>
    "tpu.trace_start"() <{level = 10 : i32, message = "bqd,bkd->bqk"}> : () -> ()
    %cst_27 = arith.constant dense<0.000000e+00> : vector<1x8x8xf32>
    %85 = tpu.matmul %82, %83, %cst_27 {dimension_numbers = #tpu.dot_dimension_numbers<[2], [2], [1], [1], [0, 0, 0, 1, 1, 1], [0], [0]>} : vector<1x8x8xbf16>, vector<1x8x8xbf16>, vector<1x8x8xf32> -> vector<1x8x8xf32>
    "tpu.trace_stop"() : () -> ()
    %cst_28 = arith.constant dense<0xFF800000> : vector<1x8xf32>
    %86 = vector.multi_reduction <maximumf>, %85, %cst_28 [2] : vector<1x8x8xf32> to vector<1x8xf32>
    %87 = vector.shape_cast %86 : vector<1x8xf32> to vector<1x8x1xf32>
    %88 = vector.broadcast %87 : vector<1x8x1xf32> to vector<1x8x8xf32>
    %89 = arith.subf %85, %88 : vector<1x8x8xf32>
    %90 = math.exp %89 : vector<1x8x8xf32>
    %cst_29 = arith.constant dense<0.000000e+00> : vector<1x8xf32>
    %91 = vector.multi_reduction <add>, %90, %cst_29 [2] : vector<1x8x8xf32> to vector<1x8xf32>
    %92 = vector.shape_cast %91 : vector<1x8xf32> to vector<1x8x1xf32>
    %93 = tpu.reciprocal %92 {approx = true} : vector<1x8x1xf32> -> vector<1x8x1xf32>
    %94 = vector.broadcast %93 : vector<1x8x1xf32> to vector<1x8x8xf32>
    %95 = arith.mulf %90, %94 : vector<1x8x8xf32>
    %96 = arith.truncf %95 : vector<1x8x8xf32> to vector<1x8x8xbf16>
    "tpu.trace_start"() <{level = 10 : i32, message = "bqk,bkd->bqd"}> : () -> ()
    %cst_30 = arith.constant dense<0.000000e+00> : vector<1x8x8xf32>
    %97 = tpu.matmul %96, %84, %cst_30 {dimension_numbers = #tpu.dot_dimension_numbers<[2], [1], [1], [2], [0, 0, 0, 1, 1, 2], [0], [0]>} : vector<1x8x8xbf16>, vector<1x8x8xbf16>, vector<1x8x8xf32> -> vector<1x8x8xf32>
    "tpu.trace_stop"() : () -> ()
    %98 = vector.shape_cast %97 : vector<1x8x8xf32> to vector<8x8xf32>
    %99 = arith.truncf %98 : vector<8x8xf32> to vector<8x8xbf16>
    %100 = vector.extract_strided_slice %14 {offsets = [3, 0, 0], sizes = [1, 8, 32], strides = [1, 1, 1]} : vector<4x8x32xbf16> to vector<1x8x32xbf16>
    %101 = vector.shape_cast %100 : vector<1x8x32xbf16> to vector<8x32xbf16>
    %cst_31 = arith.constant dense<0.000000e+00> : vector<8x32xf32>
    %102 = tpu.matmul %99, %101, %cst_31 {dimension_numbers = #tpu.dot_dimension_numbers<[1], [0], [0], [1], [0, 0, 1, 1], [], []>} : vector<8x8xbf16>, vector<8x32xbf16>, vector<8x32xf32> -> vector<8x32xf32>
    %103 = arith.addf %81, %102 : vector<8x32xf32>
    %104 = arith.addf %8, %103 : vector<8x32xf32>
    %105 = vector.shape_cast %104 : vector<8x32xf32> to vector<1x8x32xf32>
    %106 = arith.truncf %105 : vector<1x8x32xf32> to vector<1x8x32xbf16>
    %c0_32 = arith.constant 0 : index
    %c0_33 = arith.constant 0 : index
    %c0_34 = arith.constant 0 : index
    %107 = vector.load %arg6[%c0_32, %c0_33, %c0_34] : memref<1x8x32xbf16, #tpu.memory_space<vmem>>, vector<1x8x32xbf16>
    tpu.vector_store %arg6[%c0_32, %c0_33, %c0_34], %106 {strides = array<i32>} : memref<1x8x32xbf16, #tpu.memory_space<vmem>>, vector<1x8x32xbf16>,
    %cst_35 = arith.constant dense<0.000000e+00> : vector<32xf32>
    %108 = vector.multi_reduction <add>, %104, %cst_35 [0] : vector<8x32xf32> to vector<32xf32>
    %109 = vector.shape_cast %108 : vector<32xf32> to vector<1x32xf32>
    %110 = arith.mulf %104, %104 : vector<8x32xf32>
    %cst_36 = arith.constant dense<0.000000e+00> : vector<32xf32>
    %111 = vector.multi_reduction <add>, %110, %cst_36 [0] : vector<8x32xf32> to vector<32xf32>
    %112 = vector.shape_cast %111 : vector<32xf32> to vector<1x32xf32>
    %113 = tpu.concatenate %109, %112 in 0 : vector<1x32xf32>, vector<1x32xf32> -> vector<2x32xf32>
    %114 = vector.shape_cast %113 : vector<2x32xf32> to vector<1x2x32xf32>
    %c0_37 = arith.constant 0 : index
    %c0_38 = arith.constant 0 : index
    %c0_39 = arith.constant 0 : index
    %115 = vector.load %arg7[%c0_37, %c0_38, %c0_39] : memref<1x2x32xf32, #tpu.memory_space<vmem>>, vector<1x2x32xf32>
    tpu.vector_store %arg7[%c0_37, %c0_38, %c0_39], %114 {strides = array<i32>} : memref<1x2x32xf32, #tpu.memory_space<vmem>>, vector<1x2x32xf32>,
    return
  }
  func.func @transform_0(%arg0: i32) -> (i32, i32, i32) {
    %c0_i32 = arith.constant 0 : i32
    %c0_i32_0 = arith.constant 0 : i32
    %c0_i32_1 = arith.constant 0 : i32
    return %arg0, %c0_i32, %c0_i32_0 : i32, i32, i32
  }
  func.func @transform_1(%arg0: i32) -> (i32, i32) {
    %c0_i32 = arith.constant 0 : i32
    %c0_i32_0 = arith.constant 0 : i32
    %c0_i32_1 = arith.constant 0 : i32
    return %c0_i32, %c0_i32_0 : i32, i32
  }
  func.func @transform_2(%arg0: i32) -> (i32, i32) {
    %c0_i32 = arith.constant 0 : i32
    %c0_i32_0 = arith.constant 0 : i32
    %c0_i32_1 = arith.constant 0 : i32
    return %c0_i32, %c0_i32_0 : i32, i32
  }
  func.func @transform_3(%arg0: i32) -> (i32, i32) {
    %c0_i32 = arith.constant 0 : i32
    %c0_i32_0 = arith.constant 0 : i32
    %c0_i32_1 = arith.constant 0 : i32
    return %c0_i32, %c0_i32_0 : i32, i32
  }
  func.func @transform_4(%arg0: i32) -> (i32, i32, i32) {
    %c0_i32 = arith.constant 0 : i32
    %c0_i32_0 = arith.constant 0 : i32
    %c0_i32_1 = arith.constant 0 : i32
    %c0_i32_2 = arith.constant 0 : i32
    return %c0_i32, %c0_i32_0, %c0_i32_1 : i32, i32, i32
  }
  func.func @transform_5(%arg0: i32) -> (i32, i32, i32) {
    %c0_i32 = arith.constant 0 : i32
    %c0_i32_0 = arith.constant 0 : i32
    %c0_i32_1 = arith.constant 0 : i32
    return %arg0, %c0_i32, %c0_i32_0 : i32, i32, i32
  }
  func.func @transform_6(%arg0: i32) -> (i32, i32, i32) {
    %c0_i32 = arith.constant 0 : i32
    %c0_i32_0 = arith.constant 0 : i32
    %c0_i32_1 = arith.constant 0 : i32
    return %arg0, %c0_i32, %c0_i32_0 : i32, i32, i32
  }
}

module attributes {stable_mosaic.version = 11 : i64} {
  func.func @_ffn_layer_kernel(%arg0: i32, %arg1: memref<1x8x32xbf16, #tpu.memory_space<vmem>>, %arg2: memref<1x32xf32, #tpu.memory_space<vmem>>, %arg3: memref<1x32xf32, #tpu.memory_space<vmem>>, %arg4: memref<32x64xbf16, #tpu.memory_space<vmem>>, %arg5: memref<1x64xf32, #tpu.memory_space<vmem>>, %arg6: memref<64x32xbf16, #tpu.memory_space<vmem>>, %arg7: memref<1x32xf32, #tpu.memory_space<vmem>>, %arg8: memref<1x8x32xbf16, #tpu.memory_space<vmem>>, %arg9: memref<1x2x32xf32, #tpu.memory_space<vmem>>) attributes {dimension_semantics = [#tpu.dimension_semantics<parallel>], iteration_bounds = array<i64: 2>, scalar_prefetch = 0 : i64, scratch_operands = 0 : i64, tpu.core_type = #tpu.core_type<tc>, window_params = [{transform_indices = @transform_0, window_bounds = array<i64: 1, 8, 32>}, {pipeline_mode = #tpu.pipeline_mode<synchronous>, transform_indices = @transform_1, window_bounds = array<i64: 1, 32>}, {pipeline_mode = #tpu.pipeline_mode<synchronous>, transform_indices = @transform_2, window_bounds = array<i64: 1, 32>}, {pipeline_mode = #tpu.pipeline_mode<synchronous>, transform_indices = @transform_3, window_bounds = array<i64: 32, 64>}, {pipeline_mode = #tpu.pipeline_mode<synchronous>, transform_indices = @transform_4, window_bounds = array<i64: 1, 64>}, {pipeline_mode = #tpu.pipeline_mode<synchronous>, transform_indices = @transform_5, window_bounds = array<i64: 64, 32>}, {pipeline_mode = #tpu.pipeline_mode<synchronous>, transform_indices = @transform_6, window_bounds = array<i64: 1, 32>}, {transform_indices = @transform_7, window_bounds = array<i64: 1, 8, 32>}, {transform_indices = @transform_8, window_bounds = array<i64: 1, 2, 32>}]} {
    %c0 = arith.constant 0 : index
    %c0_0 = arith.constant 0 : index
    %c0_1 = arith.constant 0 : index
    %0 = vector.load %arg1[%c0, %c0_0, %c0_1] : memref<1x8x32xbf16, #tpu.memory_space<vmem>>, vector<1x8x32xbf16>
    %1 = arith.extf %0 : vector<1x8x32xbf16> to vector<1x8x32xf32>
    %2 = vector.shape_cast %1 : vector<1x8x32xf32> to vector<8x32xf32>
    %c0_2 = arith.constant 0 : index
    %c0_3 = arith.constant 0 : index
    %3 = vector.load %arg2[%c0_2, %c0_3] : memref<1x32xf32, #tpu.memory_space<vmem>>, vector<1x32xf32>
    %4 = vector.broadcast %3 : vector<1x32xf32> to vector<8x32xf32>
    %5 = arith.mulf %2, %4 : vector<8x32xf32>
    %c0_4 = arith.constant 0 : index
    %c0_5 = arith.constant 0 : index
    %6 = vector.load %arg3[%c0_4, %c0_5] : memref<1x32xf32, #tpu.memory_space<vmem>>, vector<1x32xf32>
    %7 = vector.broadcast %6 : vector<1x32xf32> to vector<8x32xf32>
    %8 = arith.addf %5, %7 : vector<8x32xf32>
    %c0_6 = arith.constant 0 : index
    %c0_7 = arith.constant 0 : index
    %9 = vector.load %arg4[%c0_6, %c0_7] : memref<32x64xbf16, #tpu.memory_space<vmem>>, vector<32x64xbf16>
    %10 = arith.truncf %8 : vector<8x32xf32> to vector<8x32xbf16>
    %cst = arith.constant dense<0.000000e+00> : vector<8x64xf32>
    %11 = tpu.matmul %10, %9, %cst {dimension_numbers = #tpu.dot_dimension_numbers<[1], [0], [0], [1], [0, 0, 1, 1], [], []>} : vector<8x32xbf16>, vector<32x64xbf16>, vector<8x64xf32> -> vector<8x64xf32>
    %c0_8 = arith.constant 0 : index
    %c0_9 = arith.constant 0 : index
    %12 = vector.load %arg5[%c0_8, %c0_9] : memref<1x64xf32, #tpu.memory_space<vmem>>, vector<1x64xf32>
    %13 = vector.broadcast %12 : vector<1x64xf32> to vector<8x64xf32>
    %14 = arith.addf %11, %13 : vector<8x64xf32>
    %cst_10 = arith.constant 0.000000e+00 : f32
    %15 = vector.broadcast %cst_10 : f32 to vector<8x64xf32>
    %16 = arith.maximumf %14, %15 : vector<8x64xf32>
    %c0_11 = arith.constant 0 : index
    %c0_12 = arith.constant 0 : index
    %17 = vector.load %arg6[%c0_11, %c0_12] : memref<64x32xbf16, #tpu.memory_space<vmem>>, vector<64x32xbf16>
    %18 = arith.truncf %16 : vector<8x64xf32> to vector<8x64xbf16>
    %cst_13 = arith.constant dense<0.000000e+00> : vector<8x32xf32>
    %19 = tpu.matmul %18, %17, %cst_13 {dimension_numbers = #tpu.dot_dimension_numbers<[1], [0], [0], [1], [0, 0, 1, 1], [], []>} : vector<8x64xbf16>, vector<64x32xbf16>, vector<8x32xf32> -> vector<8x32xf32>
    %c0_14 = arith.constant 0 : index
    %c0_15 = arith.constant 0 : index
    %20 = vector.load %arg7[%c0_14, %c0_15] : memref<1x32xf32, #tpu.memory_space<vmem>>, vector<1x32xf32>
    %21 = vector.broadcast %20 : vector<1x32xf32> to vector<8x32xf32>
    %22 = arith.addf %19, %21 : vector<8x32xf32>
    %23 = arith.addf %8, %22 : vector<8x32xf32>
    %24 = vector.shape_cast %23 : vector<8x32xf32> to vector<1x8x32xf32>
    %25 = arith.truncf %24 : vector<1x8x32xf32> to vector<1x8x32xbf16>
    %c0_16 = arith.constant 0 : index
    %c0_17 = arith.constant 0 : index
    %c0_18 = arith.constant 0 : index
    %26 = vector.load %arg8[%c0_16, %c0_17, %c0_18] : memref<1x8x32xbf16, #tpu.memory_space<vmem>>, vector<1x8x32xbf16>
    tpu.vector_store %arg8[%c0_16, %c0_17, %c0_18], %25 {strides = array<i32>} : memref<1x8x32xbf16, #tpu.memory_space<vmem>>, vector<1x8x32xbf16>,
    %cst_19 = arith.constant dense<0.000000e+00> : vector<32xf32>
    %27 = vector.multi_reduction <add>, %23, %cst_19 [0] : vector<8x32xf32> to vector<32xf32>
    %28 = vector.shape_cast %27 : vector<32xf32> to vector<1x32xf32>
    %29 = arith.mulf %23, %23 : vector<8x32xf32>
    %cst_20 = arith.constant dense<0.000000e+00> : vector<32xf32>
    %30 = vector.multi_reduction <add>, %29, %cst_20 [0] : vector<8x32xf32> to vector<32xf32>
    %31 = vector.shape_cast %30 : vector<32xf32> to vector<1x32xf32>
    %32 = tpu.concatenate %28, %31 in 0 : vector<1x32xf32>, vector<1x32xf32> -> vector<2x32xf32>
    %33 = vector.shape_cast %32 : vector<2x32xf32> to vector<1x2x32xf32>
    %c0_21 = arith.constant 0 : index
    %c0_22 = arith.constant 0 : index
    %c0_23 = arith.constant 0 : index
    %34 = vector.load %arg9[%c0_21, %c0_22, %c0_23] : memref<1x2x32xf32, #tpu.memory_space<vmem>>, vector<1x2x32xf32>
    tpu.vector_store %arg9[%c0_21, %c0_22, %c0_23], %33 {strides = array<i32>} : memref<1x2x32xf32, #tpu.memory_space<vmem>>, vector<1x2x32xf32>,
    return
  }
  func.func @transform_0(%arg0: i32) -> (i32, i32, i32) {
    %c0_i32 = arith.constant 0 : i32
    %c0_i32_0 = arith.constant 0 : i32
    %c0_i32_1 = arith.constant 0 : i32
    return %arg0, %c0_i32, %c0_i32_0 : i32, i32, i32
  }
  func.func @transform_1(%arg0: i32) -> (i32, i32) {
    %c0_i32 = arith.constant 0 : i32
    %c0_i32_0 = arith.constant 0 : i32
    %c0_i32_1 = arith.constant 0 : i32
    return %c0_i32, %c0_i32_0 : i32, i32
  }
  func.func @transform_2(%arg0: i32) -> (i32, i32) {
    %c0_i32 = arith.constant 0 : i32
    %c0_i32_0 = arith.constant 0 : i32
    %c0_i32_1 = arith.constant 0 : i32
    return %c0_i32, %c0_i32_0 : i32, i32
  }
  func.func @transform_3(%arg0: i32) -> (i32, i32) {
    %c0_i32 = arith.constant 0 : i32
    %c0_i32_0 = arith.constant 0 : i32
    %c0_i32_1 = arith.constant 0 : i32
    return %c0_i32, %c0_i32_0 : i32, i32
  }
  func.func @transform_4(%arg0: i32) -> (i32, i32) {
    %c0_i32 = arith.constant 0 : i32
    %c0_i32_0 = arith.constant 0 : i32
    %c0_i32_1 = arith.constant 0 : i32
    return %c0_i32, %c0_i32_0 : i32, i32
  }
  func.func @transform_5(%arg0: i32) -> (i32, i32) {
    %c0_i32 = arith.constant 0 : i32
    %c0_i32_0 = arith.constant 0 : i32
    %c0_i32_1 = arith.constant 0 : i32
    return %c0_i32, %c0_i32_0 : i32, i32
  }
  func.func @transform_6(%arg0: i32) -> (i32, i32) {
    %c0_i32 = arith.constant 0 : i32
    %c0_i32_0 = arith.constant 0 : i32
    %c0_i32_1 = arith.constant 0 : i32
    return %c0_i32, %c0_i32_0 : i32, i32
  }
  func.func @transform_7(%arg0: i32) -> (i32, i32, i32) {
    %c0_i32 = arith.constant 0 : i32
    %c0_i32_0 = arith.constant 0 : i32
    %c0_i32_1 = arith.constant 0 : i32
    return %arg0, %c0_i32, %c0_i32_0 : i32, i32, i32
  }
  func.func @transform_8(%arg0: i32) -> (i32, i32, i32) {
    %c0_i32 = arith.constant 0 : i32
    %c0_i32_0 = arith.constant 0 : i32
    %c0_i32_1 = arith.constant 0 : i32
    return %arg0, %c0_i32, %c0_i32_0 : i32, i32, i32
  }
}

module attributes {stable_mosaic.version = 11 : i64} {
  func.func @_final_bn_mean_kernel(%arg0: i32, %arg1: memref<1x8x32xbf16, #tpu.memory_space<vmem>>, %arg2: memref<1x32xf32, #tpu.memory_space<vmem>>, %arg3: memref<1x32xf32, #tpu.memory_space<vmem>>, %arg4: memref<1x8x32xf32, #tpu.memory_space<vmem>>, %arg5: memref<1x1x32xf32, #tpu.memory_space<vmem>>) attributes {dimension_semantics = [#tpu.dimension_semantics<parallel>], iteration_bounds = array<i64: 2>, scalar_prefetch = 0 : i64, scratch_operands = 0 : i64, tpu.core_type = #tpu.core_type<tc>, window_params = [{transform_indices = @transform_0, window_bounds = array<i64: 1, 8, 32>}, {pipeline_mode = #tpu.pipeline_mode<synchronous>, transform_indices = @transform_1, window_bounds = array<i64: 1, 32>}, {pipeline_mode = #tpu.pipeline_mode<synchronous>, transform_indices = @transform_2, window_bounds = array<i64: 1, 32>}, {transform_indices = @transform_3, window_bounds = array<i64: 1, 8, 32>}, {transform_indices = @transform_4, window_bounds = array<i64: 1, 1, 32>}]} {
    %c0 = arith.constant 0 : index
    %c0_0 = arith.constant 0 : index
    %c0_1 = arith.constant 0 : index
    %0 = vector.load %arg1[%c0, %c0_0, %c0_1] : memref<1x8x32xbf16, #tpu.memory_space<vmem>>, vector<1x8x32xbf16>
    %1 = arith.extf %0 : vector<1x8x32xbf16> to vector<1x8x32xf32>
    %2 = vector.shape_cast %1 : vector<1x8x32xf32> to vector<8x32xf32>
    %c0_2 = arith.constant 0 : index
    %c0_3 = arith.constant 0 : index
    %3 = vector.load %arg2[%c0_2, %c0_3] : memref<1x32xf32, #tpu.memory_space<vmem>>, vector<1x32xf32>
    %4 = vector.broadcast %3 : vector<1x32xf32> to vector<8x32xf32>
    %5 = arith.mulf %2, %4 : vector<8x32xf32>
    %c0_4 = arith.constant 0 : index
    %c0_5 = arith.constant 0 : index
    %6 = vector.load %arg3[%c0_4, %c0_5] : memref<1x32xf32, #tpu.memory_space<vmem>>, vector<1x32xf32>
    %7 = vector.broadcast %6 : vector<1x32xf32> to vector<8x32xf32>
    %8 = arith.addf %5, %7 : vector<8x32xf32>
    %9 = vector.shape_cast %8 : vector<8x32xf32> to vector<1x8x32xf32>
    %c0_6 = arith.constant 0 : index
    %c0_7 = arith.constant 0 : index
    %c0_8 = arith.constant 0 : index
    %10 = vector.load %arg4[%c0_6, %c0_7, %c0_8] : memref<1x8x32xf32, #tpu.memory_space<vmem>>, vector<1x8x32xf32>
    tpu.vector_store %arg4[%c0_6, %c0_7, %c0_8], %9 {strides = array<i32>} : memref<1x8x32xf32, #tpu.memory_space<vmem>>, vector<1x8x32xf32>,
    %cst = arith.constant dense<0.000000e+00> : vector<1x32xf32>
    %11 = vector.multi_reduction <add>, %9, %cst [1] : vector<1x8x32xf32> to vector<1x32xf32>
    %12 = vector.shape_cast %11 : vector<1x32xf32> to vector<1x1x32xf32>
    %cst_9 = arith.constant 8.000000e+00 : f32
    %13 = vector.broadcast %cst_9 : f32 to vector<1x1x32xf32>
    %14 = arith.divf %12, %13 : vector<1x1x32xf32>
    %c0_10 = arith.constant 0 : index
    %c0_11 = arith.constant 0 : index
    %c0_12 = arith.constant 0 : index
    %15 = vector.load %arg5[%c0_10, %c0_11, %c0_12] : memref<1x1x32xf32, #tpu.memory_space<vmem>>, vector<1x1x32xf32>
    tpu.vector_store %arg5[%c0_10, %c0_11, %c0_12], %14 {strides = array<i32>} : memref<1x1x32xf32, #tpu.memory_space<vmem>>, vector<1x1x32xf32>,
    return
  }
  func.func @transform_0(%arg0: i32) -> (i32, i32, i32) {
    %c0_i32 = arith.constant 0 : i32
    %c0_i32_0 = arith.constant 0 : i32
    %c0_i32_1 = arith.constant 0 : i32
    return %arg0, %c0_i32, %c0_i32_0 : i32, i32, i32
  }
  func.func @transform_1(%arg0: i32) -> (i32, i32) {
    %c0_i32 = arith.constant 0 : i32
    %c0_i32_0 = arith.constant 0 : i32
    %c0_i32_1 = arith.constant 0 : i32
    return %c0_i32, %c0_i32_0 : i32, i32
  }
  func.func @transform_2(%arg0: i32) -> (i32, i32) {
    %c0_i32 = arith.constant 0 : i32
    %c0_i32_0 = arith.constant 0 : i32
    %c0_i32_1 = arith.constant 0 : i32
    return %c0_i32, %c0_i32_0 : i32, i32
  }
  func.func @transform_3(%arg0: i32) -> (i32, i32, i32) {
    %c0_i32 = arith.constant 0 : i32
    %c0_i32_0 = arith.constant 0 : i32
    %c0_i32_1 = arith.constant 0 : i32
    return %arg0, %c0_i32, %c0_i32_0 : i32, i32, i32
  }
  func.func @transform_4(%arg0: i32) -> (i32, i32, i32) {
    %c0_i32 = arith.constant 0 : i32
    %c0_i32_0 = arith.constant 0 : i32
    %c0_i32_1 = arith.constant 0 : i32
    return %arg0, %c0_i32, %c0_i32_0 : i32, i32, i32
  }
}

</mosaic_0001>

<bundles_post_ra>
// kernel: graph_attention_encoder.9
= control target key start
LH: loop header
LB: loop body
LE: loop exit
PB: predicated region body
PF: predicated region fallthrough
CT: control target
= control target key end

     0   :  { %10 = vsyncpa [#allocation3], 0  ;;  %s646_s0 = inlined_call_operand.vmem [shape: bf16[2,8,32], index: 0, kind: input, shape index: {}]   ;;  %s647_s1 = inlined_call_operand.vmem [shape: f32[1,32], index: 1, kind: input, shape index: {}]   ;;  %s648_s2 = inlined_call_operand.vmem [shape: f32[1,32], index: 2, kind: input, shape index: {}]   ;;  %s649_s3 = inlined_call_operand.hbm [shape: f32[2,8,32], index: 3, kind: output, shape index: {0}]   ;;  %s650_s4 = inlined_call_operand.hbm [shape: f32[2,1,32], index: 4, kind: output, shape index: {1}]  }
   0x1   :  { %12 = vsyncpa [#allocation3 + $0x1], 0 }
   0x2   :  { %13 = vsyncpa [#allocation5], 0 }
   0x3   :  { %15 = vsyncpa [#allocation5 + $0x1], 0  ;;  %s535_s15 = smov 0   ;;  %s537_s16 = smov 0  }
   0x4   :  { %s539_s17 = smov 0   ;;  %s541_s18 = smov 0  }
   0x5 LB: > { %s556_s19 = sadd.s32 4294967295, %s507_s18   ;;  %s354_s20 = sadd.s32 4294967294, %s507_s18   ;;  %s507_s18 = sphi %s541_s18, %s656_s18   ;;  %s503_s17 = sphi %s539_s17, %s655_s17   ;;  %s499_s16 = sphi %s537_s16, %s654_s16   ;;  %s495_s15 = sphi %s535_s15, %s653_s15  }
   0x6   : > { %s560_s21 = sadd.s32 1, %s507_s18   ;;  %s96_s22 = sadd.s32 1, %s503_s17 }
   0x7   : > { %s93_s23 = ssub.s32 %s507_s18, %s560_s21  ;;  %p106_p0 = scmp.ne.s32.totalorder %s503_s17, %s499_s16 }
   0x8   : > { %p94_p1 = scmp.eq.s32.totalorder %s93_s23, 0  ;;  %p107_p2 = scmp.eq.s32.totalorder %s556_s19, 1 }
   0x9   : > { %p112_p3 = scmp.ne.s32.totalorder %s499_s16, %s495_s15  ;;  %p113_p4 = scmp.eq.s32.totalorder %s354_s20, 1 }
   0xa   : > { %s571_s24 = scalar_select %p94_p1, %s503_s17, %s96_s22  }
   0xb   : > { %p573_p5 = por %p107_p2, %p106_p0  ;;  %p577_p6 = por %p113_p4, %p112_p3 }
   0xc   : > { %p357_p7 = scmp.ge.s32.totalorder %s507_s18, 1  ;;  %p170_p8 = scmp.lt.s32.totalorder %s507_s18, 3 }
   0xe   : > { %p171_p9 = pnand %p357_p7, %p170_p8 }
   0xf   : > { %s584_s27 = sand.u32 (!%p171_p9), 1, %s499_s16   ;;  %p199_p10 = scmp.lt.s32.totalorder (!%p171_p9), %s556_s19, 1 }
  0x10   : > { %174 = sbr.rel (%p171_p9) target bundleno = 51 (0x33), region = 32  ;;  %s358_s28 = sshll.u32 (!%p171_p9), %s584_s27, 3 }
  0x11   : > { %s361_s10 = sshll.u32 (!%p171_p9), %s556_s19, 3  ;;  %s192_s13 = scalar_lea.vmem (!%p171_p9), [#allocation2], %s358_s28 }
  0x12   : > { %s251_s14 = sshll.u32 (!%p171_p9), %s192_s13, 4  ;;  %s249_s23 = scalar_lea.hbm (!%p171_p9), %s649_s3, %s361_s10  ;;  %s252_s14 = int_to_ptr.vmem [resolvable:$true] %s251_s14 }
  0x13   : > { %s433_s8 = scalar_lea.hbm (!%p171_p9), %s649_s3, 16 }
  0x15   : > { %s200_s29 = scalar_select %p199_p10, %s556_s19, 1  ;;  %v509_v0 = vmov 8.0   ;;  %v409_v1 = vld [vmem:[%s647_s1] ss:$0 sm:$0xff]  ;;  %vm215_vm0 = vcmask 261120  }
  0x16   : > { %411 = vrcp.f32 %v509_v0  ;;  %v410_v4 = vld [vmem:[%s648_s2] ss:$0 sm:$0xff] }
  0x17   : > { %s359_s30 = sshll.u32 %s200_s29, 2  ;;  %s253_s29 = sshll.u32 %s249_s23, 4  ;;  %s254_s29 = int_to_ptr.hbm [resolvable:$true] %s253_s29 }
  0x18   : > { %s202_s7 = scalar_lea.vmem %s646_s0, %s359_s30  ;;  %s235_s30 = scalar_lea.sflag [#allocation3], %s584_s27 }
  0x19   : > { %v203_v2 = vld [vmem:[%s202_s7] sm:$0xf]  ;;  %s427_s28 = sshra.s32 %s254_s29, 4  ;;  %s428_s28 = int_to_ptr.hbm [resolvable:$true] %s427_s28 }
  0x1a   : > { %v204_v3 = vunpack.c.l.bf16 %v203_v2  ;;  %s429_s5 = scalar_lea.hbm %s428_s28, 8  ;;  %p434_p0 = scmp.lt.s32.totalorder %s428_s28, %s649_s3 }
  0x1b   : > { %p430_p11 = scmp.ne.s32.totalorder %s428_s28, %s429_s5  ;;  %p435_p1 = scmp.lt.s32.totalorder %s433_s8, %s429_s5 }
  0x1c   : > { %v412_v5 = vpop.eup %411  ;;  %v209_v6 = vmul.f32 %v409_v1, %v204_v3 }
  0x1d   : > { %v225_v7 = vmul.f32 8.0, %v412_v5  ;;  %p431_p12 = pnand %p430_p11, %p573_p5  ;;  %p436_p2 = por %p435_p1, %p434_p0 }
  0x1e   : > { %v214_v8 = vadd.f32 %v410_v4, %v209_v6 }
  0x1f   : > { %v226_v9 = vsub.f32 1.0, %v225_v7  ;;  %p432_p13 = pneg %p431_p12 }
  0x20   : > { %216 = vst.msk [vmem:[%s192_s13] sm:$0xff] %vm215_vm0, %v214_v8  ;;  %v217_v10 = vsel %vm215_vm0, %v214_v8, 0.0 }
  0x21   : > { %v218_v11 = vrot.slane %v217_v10, 4  ;;  %p437_p3 = pnand %p436_p2, %p432_p13 }
  0x23   : > { %440 = shalt.err (!%p437_p3)
}
  0x24   : > { %364 = dma.vmem_to_hbm [thread:$0]  (%p573_p5), %s252_s14, 128, %s254_s29, %s235_s30   ;;  %v227_v12 = vmul.f32 %v412_v5, %v226_v9  ;;  %v219_v13 = vadd.f32 %v218_v11, %v217_v10  ;;  %vm229_vm1 = vweird.f32 %v412_v5  ;;  %vm232_vm2 = vcmask 253952  }
  0x25   : > { %s262_s13 = scalar_lea.hbm %s650_s4, %s556_s19  ;;  %s198_s20 = scalar_lea.vmem [#allocation4], %s584_s27 }
  0x26   : > { %v220_v14 = vrot.slane %v219_v13, 2  ;;  %v228_v15 = vadd.f32 %v412_v5, %v227_v12  ;;  %s264_s22 = sshll.u32 %s198_s20, 4  ;;  %s266_s23 = sshll.u32 %s262_s13, 4  ;;  %s265_s22 = int_to_ptr.vmem [resolvable:$true] %s264_s22  ;;  %s267_s23 = int_to_ptr.hbm [resolvable:$true] %s266_s23 }
  0x27   : > { %s240_s14 = scalar_lea.sflag [#allocation5], %s584_s27  ;;  %s455_s29 = sshra.s32 %s267_s23, 4  ;;  %s456_s29 = int_to_ptr.hbm [resolvable:$true] %s455_s29 }
  0x28   : > { %v221_v16 = vadd.f32 %v220_v14, %v219_v13  ;;  %v230_v18 = vsel %vm229_vm1, %v412_v5, %v228_v15  ;;  %s457_s30 = scalar_lea.hbm %s456_s29, 1  ;;  %s461_s5 = scalar_lea.hbm %s650_s4, 2 }
  0x29   : > { %p458_p4 = scmp.ne.s32.totalorder %s456_s29, %s457_s30  ;;  %p462_p9 = scmp.lt.s32.totalorder %s456_s29, %s650_s4 }
  0x2a   : > { %v222_v17 = vrot.slane %v221_v16, 1  ;;  %p463_p10 = scmp.lt.s32.totalorder %s461_s5, %s457_s30 }
  0x2b   : > { %p459_p7 = pnand %p458_p4, %p573_p5 }
  0x2c   : > { %v223_v19 = vadd.f32 %v222_v17, %v221_v16  ;;  %p464_p11 = por %p463_p10, %p462_p9 }
  0x2d   : > { %p460_p8 = pneg %p459_p7 }
  0x2e   : > { %v231_v20 = vmul.f32 %v230_v18, %v223_v19 }
  0x2f   : > { %p465_p12 = pnand %p464_p11, %p460_p8 }
  0x30   : > { %233 = vst.msk [vmem:[%s198_s20] sm:$0x1] %vm232_vm2, %v231_v20 }
  0x31   : > { %468 = shalt.err (!%p465_p12)
}
  0x32   : > { %365 = dma.vmem_to_hbm [thread:$0]  (%p573_p5), %s265_s22, 16, %s267_s23, %s240_s14  }
  0x33 PF: > { %p375_p13 = scmp.ge.s32.totalorder %s507_s18, 2  ;;  %s278_s27 = sand.u32 1, %s495_s15  }
  0x34   : > { %s279_s8 = scalar_lea.sflag [#allocation3], %s278_s27 }
  0x35   : > { %p369_p0 = pnand %p375_p13, %p577_p6 }
  0x37   : > { %p370_p1 = pneg %p369_p0 }
  0x39   : > { %486 = dma.done.wait (%p370_p1), %s279_s8, 128  }
  0x3a   : > { %488 = vsyncadd (%p370_p1), %s279_s8, 4294967168  ;;  %s289_s9 = scalar_lea.sflag [#allocation5], %s278_s27 }
  0x3b   : > { %490 = dma.done.wait (%p370_p1), %s289_s9, 16  }
  0x3c   : > { %492 = vsyncadd (%p370_p1), %s289_s9, 4294967280  ;;  %p18_p5 = scmp.ge.s32.totalorder %s560_s21, 4   ;;  %s653_s15 = smov %s499_s16 }
  0x3d   : > { %s654_s16 = smov %s503_s17  ;;  %s655_s17 = smov %s571_s24 }
  0x3e   : > { %s656_s18 = smov %s560_s21  ;;  %20 = sbr.rel (!%p18_p5) target bundleno = 5 (0x5), region = 84 }
  0x43   :  { %294 = vsyncpa [#allocation3], 1 }
  0x44   :  { %296 = vsyncpa [#allocation3 + $0x1], 1 }
  0x45   :  { %297 = vsyncpa [#allocation5], 1 }
  0x46   :  { %299 = vsyncpa [#allocation5 + $0x1], 1 }

// kernel: graph_attention_encoder.6
= control target key start
LH: loop header
LB: loop body
LE: loop exit
PB: predicated region body
PF: predicated region fallthrough
CT: control target
= control target key end

     0   :  { %s632_s27 = smov 0   ;;  %s693_s0 = inlined_call_operand.vmem [shape: bf16[2,8,32], index: 0, kind: input, shape index: {}]   ;;  %s694_s1 = inlined_call_operand.vmem [shape: f32[1,32], index: 1, kind: input, shape index: {}]   ;;  %s695_s2 = inlined_call_operand.vmem [shape: f32[1,32], index: 2, kind: input, shape index: {}]   ;;  %s696_s3 = inlined_call_operand.vmem [shape: bf16[32,64], index: 3, kind: input, shape index: {}]   ;;  %s697_s4 = inlined_call_operand.vmem [shape: f32[1,64], index: 4, kind: input, shape index: {}]   ;;  %s698_s5 = inlined_call_operand.vmem [shape: bf16[64,32], index: 5, kind: input, shape index: {}]   ;;  %s699_s6 = inlined_call_operand.vmem [shape: f32[1,32], index: 6, kind: input, shape index: {}]   ;;  %s700_s7 = inlined_call_operand.vmem [shape: bf16[2,8,32], index: 7, kind: output, shape index: {0}]   ;;  %s701_s8 = inlined_call_operand.vmem [shape: f32[2,2,32], index: 8, kind: output, shape index: {1}]  }
   0x1 LB: > { %s525_s28 = sadd.s32 4294967295, %s585_s27   ;;  %p529_p0 = scmp.ge.s32.totalorder %s585_s27, 1  ;;  %s585_s27 = sphi %s632_s27, %s19_s27  }
   0x2   : > { %p264_p1 = scmp.lt.s32.totalorder %s585_s27, 3 }
   0x4   : > { %p265_p2 = pnand %p529_p0, %p264_p1 }
   0x5   : > { %p300_p3 = scmp.lt.s32.totalorder (!%p265_p2), %s525_s28, 1 }
   0x6   : > { %268 = sbr.rel (%p265_p2) target bundleno = 302 (0x12e), region = 48 }
   0xb   : > { %v562_v0 = vld [vmem:[%s696_s3 + $0x8] sm:$0xff]  ;;  %v561_v1 = vld [vmem:[%s696_s3] sm:$0xff]  ;;  %s703_s28 = smov (!%p300_p3, %s525_s28), 1  ;;  %v566_v2 = vld [vmem:[%s698_s5 + $0x18] sm:$0xff]  ;;  %vm346_vm0 = vcmask 261120   ;;  %vm401_vm1 = vcmask 523264  }
   0xc   : > { %356 = vmatpush.bf16.msra.mxu0 %v562_v0  ;;  %s530_s13 = sshll.u32 %s703_s28, 2  ;;  %409 = vmatpush.bf16.msra.mxu1 %v566_v2  ;;  %v565_v3 = vld [vmem:[%s698_s5 + $0x10] sm:$0xff]  ;;  %v575_v4 = vld [vmem:[%s694_s1] ss:$0 sm:$0xff]  ;;  %v564_v11 = vld [vmem:[%s698_s5 + $0x8] sm:$0xff]  ;;  %vm420_vm2 = vcmask 257024  }
   0xd   : > { %s303_s18 = scalar_lea.vmem %s693_s0, %s530_s13  ;;  %v576_v7 = vld [vmem:[%s695_s2] ss:$0 sm:$0xff]  ;;  %s307_s14 = scalar_lea.vmem %s700_s7, %s530_s13  ;;  %vm437_vm3 = vcmask 1040384   ;;  %vm439_vm4 = vcmask 254976  }
   0xe   : > { %v313_v5 = vld [vmem:[%s303_s18] sm:$0xf]  ;;  %s532_s13 = sshll.u32 %s703_s28, 1 }
   0xf   : > { %v314_v6 = vunpack.c.l.bf16 %v313_v5  ;;  %v563_v12 = vld [vmem:[%s698_s5] sm:$0xff]  ;;  %s311_s17 = scalar_lea.vmem %s701_s8, %s532_s13 }
  0x10   : > { %357 = vmatpush.bf16.msra.mxu0 %v561_v1  ;;  %410 = vmatpush.bf16.msra.mxu1 %v565_v3  ;;  %v577_v13 = vld [vmem:[%s697_s4] ss:$0 sm:$0xff] }
  0x11   : > { %v319_v8 = vmul.f32 %v575_v4, %v314_v6  ;;  %v578_v19 = vld [vmem:[%s699_s6] ss:$0 sm:$0xff] }
  0x13   : > { %v324_v9 = vadd.f32 %v576_v7, %v319_v8 }
  0x14   : > { %411 = vmatpush.bf16.msra.mxu1 %v564_v11 }
  0x15   : > { %v329_v10 = vpack.c.bf16 %v324_v9, %v324_v9 }
  0x17   : > { %541 = vmatmul.msk.bf16.vlgmr.msra.gmra.mxu0 %vm346_vm0, %v329_v10 }
  0x18   : > { %412 = vmatpush.bf16.msra.mxu1 %v563_v12 }
  0x94   : > { %v359_v14 = vpop.f32.mrf.mxu0 }
  0x95   : > { %v360_v15 = vadd.f32 %v577_v13, %v359_v14 }
  0x97   : > { %v363_v16 = vmax.f32 %v360_v15, 0.0 }
  0x99   : > { %v372_v17 = vpack.c.bf16 %v363_v16, %v363_v16 }
  0x9b   : > { %558 = vmatmul.msk.bf16.vlgmr.msra.gmra.mxu1 %vm401_vm1, %v372_v17 }
  0x9c   : > { %v361_v18 = vpop.f32.mrf.mxu0 }
 0x118   : > { %v414_v20 = vpop.f32.mrf.mxu1 }
 0x119   : > { %v415_v21 = vadd.f32 %v578_v19, %v414_v20 }
 0x11b   : > { %v418_v22 = vadd.f32 %v415_v21, %v324_v9 }
 0x11d   : > { %v419_v23 = vpack.c.bf16 %v418_v22, %v418_v22  ;;  %v422_v24 = vsel %vm346_vm0, %v418_v22, 0.0  ;;  %v429_v25 = vmul.f32 %v418_v22, %v418_v22 }
 0x11e   : > { %v423_v26 = vrot.slane %v422_v24, 4 }
 0x11f   : > { %421 = vst.msk [vmem:[%s307_s14] sm:$0xf] %vm420_vm2, %v419_v23  ;;  %v430_v27 = vsel %vm346_vm0, %v429_v25, 0.0 }
 0x120   : > { %v424_v28 = vadd.f32 %v423_v26, %v422_v24  ;;  %v431_v29 = vrot.slane %v430_v27, 4  ;;  %v416_v30 = vpop.f32.mrf.mxu1 }
 0x122   : > { %v425_v31 = vrot.slane %v424_v28, 2  ;;  %v432_v32 = vadd.f32 %v431_v29, %v430_v27 }
 0x124   : > { %v426_v33 = vadd.f32 %v425_v31, %v424_v28  ;;  %v433_v34 = vrot.slane %v432_v32, 2 }
 0x126   : > { %v427_v35 = vrot.slane %v426_v33, 1  ;;  %v434_v36 = vadd.f32 %v433_v34, %v432_v32 }
 0x128   : > { %v435_v37 = vrot.slane %v434_v36, 1  ;;  %v428_v38 = vadd.f32 %v427_v35, %v426_v33 }
 0x12a   : > { %v436_v39 = vadd.f32 %v435_v37, %v434_v36 }
 0x12c   : > { %v438_v40 = vsel %vm437_vm3, %v428_v38, %v436_v39 }
 0x12d   : > { %440 = vst.msk [vmem:[%s311_s17] sm:$0x3] %vm439_vm4, %v438_v40 }
 0x12e PF: > { %s19_s27 = sadd.s32 1, %s585_s27  }
 0x12f   : > { %p16_p4 = scmp.ge.s32.totalorder %s19_s27, 4  }
 0x131   :  { %18 = sbr.rel (!%p16_p4) target bundleno = 1 (0x1), region = 90 }

// kernel: graph_attention_encoder.5
= control target key start
LH: loop header
LB: loop body
LE: loop exit
PB: predicated region body
PF: predicated region fallthrough
CT: control target
= control target key end

     0   :  { %12 = vsyncpa [#allocation3], 0  ;;  %s1142_s0 = inlined_call_operand.vmem [shape: f32[2,8,4], index: 0, kind: input, shape index: {}]   ;;  %s1143_s1 = inlined_call_operand.hbm [shape: f32[4,32], index: 1, kind: input, shape index: {}]   ;;  %s1144_s2 = inlined_call_operand.hbm [shape: f32[1,32], index: 2, kind: input, shape index: {}]   ;;  %s1145_s3 = inlined_call_operand.vmem [shape: bf16[32,96], index: 3, kind: input, shape index: {}]   ;;  %s1146_s4 = inlined_call_operand.vmem [shape: bf16[4,8,32], index: 4, kind: input, shape index: {}]   ;;  %s1147_s5 = inlined_call_operand.vmem [shape: bf16[2,8,32], index: 5, kind: output, shape index: {0}]   ;;  %s1148_s6 = inlined_call_operand.vmem [shape: f32[2,2,32], index: 6, kind: output, shape index: {1}]  }
   0x1   :  { %13 = vsyncpa [#allocation5], 0  ;;  %s1019_s21 = smov 0  }
   0x2 LB: > { %s198_s24 = sshll.u32 %s1143_s1, 4  ;;  %s799_s25 = sadd.s32 4294967295, %s969_s21   ;;  %s969_s21 = sphi %s1019_s21, %s19_s21   ;;  %s199_s24 = int_to_ptr.hbm [resolvable:$true] %s198_s24 }
   0x3   : > { %p801_p0 = scmp.ge.s32.totalorder %s969_s21, 1  ;;  %p186_p1 = scmp.lt.s32.totalorder %s969_s21, 3 }
   0x4   : > { %p853_p2 = scmp.eq.s32.totalorder %s799_s25, 0  ;;  %s971_s27 = smov [#allocation2]  }
   0x5   : > { %p1030_p3 = pnand %p801_p0, %p186_p1  ;;  %s200_s28 = sshll.u32 %s971_s27, 4  ;;  %s201_s28 = int_to_ptr.vmem [resolvable:$true] %s200_s28 }
   0x6   : > { %s210_s7 = sshll.u32 %s1144_s2, 4  ;;  %s972_s8 = smov [#allocation4]   ;;  %s211_s7 = int_to_ptr.hbm [resolvable:$true] %s210_s7 }
   0x7   : > { %p846_p4 = pneg %p1030_p3  ;;  %s212_s9 = sshll.u32 %s972_s8, 4  ;;  %s213_s9 = int_to_ptr.vmem [resolvable:$true] %s212_s9 }
   0x8   : > { %238 = sbr.rel (%p1030_p3) target bundleno = 1631 (0x65f), region = 40 }
   0x9   : > { %p847_p5 = pnand %p853_p2, %p846_p4 }
   0xb   : > { %849 = dma.hbm_to_vmem [thread:$0]  (!%p847_p5), %s199_s24, 64, %s201_s28, [#allocation3]  }
   0xc   : > { %852 = dma.hbm_to_vmem [thread:$0]  (!%p847_p5), %s211_s7, 16, %s213_s9, [#allocation5]  }
   0xd   : > { %960 = dma.done.wait (%p853_p2), [#allocation3], 64  }
   0xe   : > { %962 = vsyncadd (%p853_p2), [#allocation3], 4294967232 }
   0xf   : > { %964 = dma.done.wait (%p853_p2), [#allocation5], 16  }
  0x10   : > { %966 = vsyncadd (%p853_p2), [#allocation5], 4294967280  ;;  %p276_p6 = scmp.lt.s32.totalorder %s799_s25, 1  ;;  %vm299_vm0 = vcmask 1043456   ;;  %vm295_vm1 = vcmask 31744   ;;  %v837_v2 = vld [vmem:[%s1145_s3 + $0x8] sm:$0xff] }
  0x11   : > { %v290_v0 = vld [vmem:[#allocation2] sm:$0xf]  ;;  %350 = vmatpush.bf16.msra.mxu1 %v837_v2  ;;  %v878_v4 = vld [vmem:[#allocation4] ss:$0 sm:$0xff]  ;;  %vm340_vm2 = vcmask 261120   ;;  %s973_s18 = smov 88  }
  0x12   : > { %s1151_s25 = smov (!%p276_p6, %s799_s25), 1  ;;  %811 = vmatpush.msk.msra.mxu0 %vm299_vm0, %v290_v0  ;;  %v836_v3 = vld [vmem:[%s1145_s3] sm:$0xff]  ;;  %s974_s19 = smov 96   ;;  %vm367_vm3 = vcmask 64512   ;;  %vm672_vm4 = vcmask 257024   ;;  %vm689_vm5 = vcmask 1040384  }
  0x13   : > { %s808_s10 = sshll.u32 %s1151_s25, 3  ;;  %s975_s20 = smov 120   ;;  %v358_v17 = vld [vmem:[%s1146_s4] sm:$0xf]  ;;  %vm691_vm6 = vcmask 254976  }
  0x14   : > { %s279_s13 = scalar_lea.vmem %s1142_s0, %s808_s10  ;;  %s976_s22 = smov 72   ;;  %v501_v20 = vsel %vm299_vm0, %v358_v17, 0 }
  0x15   : > { %v289_v1 = vld [vmem:[%s279_s13] sm:$0xff]  ;;  %351 = vmatpush.bf16.msra.mxu1 %v836_v3  ;;  %s977_s23 = smov 80   ;;  %s978_s24 = smov 104  }
  0x16   : > { %812 = vmatmul.msk.f32.vlgmr.msra.gmra.mxu0 %vm295_vm1, %v289_v1  ;;  %s979_s28 = smov 64   ;;  %s980_s29 = smov 112  }
  0x17   : > { %s981_s30 = smov 40   ;;  %s982_s7 = smov 56  }
  0x18   : > { %s983_s8 = smov 48   ;;  %s809_s15 = sshll.u32 %s1151_s25, 2 }
  0x93   : > { %v320_v5 = vpop.f32.mrf.mxu0 }
  0x94   : > { %v1059_v6 = vadd.f32 %v878_v4, %v320_v5 }
  0x96   : > { %v327_v7 = vpack.c.bf16 %v1059_v6, %v1059_v6 }
  0x98   : > { %821 = vmatmul.msk.bf16.vlgmr.msra.gmra.mxu1 %vm340_vm2, %v327_v7 }
 0x115   : > { %v353_v8 = vpop.f32.mrf.mxu1 }
 0x116   : > { %v357_v9 = vpack.c.bf16 %v353_v8, %v353_v8 }
 0x118   : > { %v363_v10 = vunpack.c.l.b16 %v357_v9 }
 0x11a   : > { %v1064_v11 = vpack.c.b16 %v363_v10, %v363_v10 }
 0x11c   : > { %423 = vrot.lane.b32.xlu2 %v1064_v11, %s973_s18  ;;  %365 = vrot.lane.b32.xlu0 %v1064_v11, %s974_s19  ;;  %s283_s18 = scalar_lea.vmem %s1147_s5, %s809_s15  ;;  %s810_s19 = sshll.u32 %s1151_s25, 1 }
 0x11d   : > { %v355_v12 = vpop.f32.mrf.mxu1 }
 0x124   : > { %421 = vrot.lane.b32.xlu2 %v1064_v11, %s975_s20 }
 0x12c   : > { %595 = vrot.lane.b32.xlu2 %v1064_v11, %s976_s22 }
 0x134   : > { %518 = vrot.lane.b32.xlu2 %v1064_v11, %s977_s23  ;;  %s287_s23 = scalar_lea.vmem %s1148_s6, %s810_s19 }
 0x13c   : > { %593 = vrot.lane.b32.xlu2 %v1064_v11, %s978_s24 }
 0x176   : > { %v424_v13 = vpop.permute.xlu2 %423 }
 0x177   : > { %v429_v14 = vsel %vm367_vm3, %v424_v13, 0 }
 0x178   : > { %438 = vmatpush.bf16.xpose.msrb.mxu0 %v429_v14 }
 0x17e   : > { %v422_v15 = vpop.permute.xlu2 %421 }
 0x17f   : > { %824 = vmatmul.msk.bf16.vlgmr.msrb.gmra.mxu0 %vm367_vm3, %v422_v15 }
 0x186   : > { %v596_v16 = vpop.permute.xlu2 %595 }
 0x187   : > { %v601_v23 = vsel %vm367_vm3, %v596_v16, 0 }
 0x18e   : > { %v519_v18 = vpop.permute.xlu2 %518  ;;  %v366_v19 = vpop.permute.xlu0 %365 }
 0x18f   : > { %v524_v21 = vsel %vm367_vm3, %v519_v18, 0  ;;  %v372_v22 = vsel %vm367_vm3, %v366_v19, 0 }
 0x190   : > { %381 = vmatpush.bf16.xpose.msra.mxu2 %v372_v22  ;;  %533 = vmatpush.bf16.xpose.msra.mxu0 %v524_v21 }
 0x196   : > { %v594_v30 = vpop.permute.xlu2 %593 }
 0x197   : > { %822 = vmatmul.msk.bf16.vlgmr.msra.gmra.mxu2 %vm367_vm3, %v357_v9 }
 0x198   : > { %510 = vmatpush.bf16.msrb.mxu2 %v501_v20  ;;  %v359_v20 = vld [vmem:[%s1146_s4 + $0x4] sm:$0xf] }
 0x199   : > { %v482_v21 = vsel %vm299_vm0, %v359_v20, 0 }
 0x19a   : > { %491 = vmatpush.bf16.msrb.mxu1 %v482_v21 }
 0x19c   : > { %610 = vmatpush.bf16.xpose.msra.mxu2 %v601_v23 }
 0x1fc   : > { %v440_v24 = vpop.f32.mrf.mxu0 }
 0x1fd   : > { %v444_v25 = vsel %vm367_vm3, %v440_v24, -inf }
 0x1fe   : > { %445 = vmax.xlane.f32.xlu2 %v444_v25  ;;  %v360_v25 = vld [vmem:[%s1146_s4 + $0x8] sm:$0xf] }
 0x204   : > { %v442_v26 = vpop.f32.mrf.mxu0 }
 0x21a   : > { %v383_v27 = vpop.f32.mrf.mxu2 }
 0x21b   : > { %v387_v28 = vsel %vm367_vm3, %v383_v27, -inf }
 0x21c   : > { %388 = vmax.xlane.f32.xlu0 %v387_v28  ;;  %v361_v28 = vld [vmem:[%s1146_s4 + $0xc] sm:$0xf] }
 0x222   : > { %v385_v29 = vpop.f32.mrf.mxu2 }
 0x223   : > { %v654_v29 = vsel %vm299_vm0, %v361_v28, 0 }
 0x271   : > { %v446_v31 = vpop.xlane.xlu2 %445 }
 0x272   : > { %v447_v32 = vsub.f32 %v440_v24, %v446_v31 }
 0x274   : > { %v448_v33 = vmul.f32 1.442695, %v447_v32 }
 0x276   : > { %879 = vpow2.f32 %v448_v33 }
 0x27c   : > { %v1084_v34 = vpop.eup %879 }
 0x27d   : > { %v450_v35 = vsel %vm367_vm3, %v1084_v34, 0.0 }
 0x27e   : > { %451 = vadd.xlane.f32.xlu0 %v450_v35 }
 0x28f   : > { %v389_v36 = vpop.xlane.xlu0 %388 }
 0x290   : > { %v390_v37 = vsub.f32 %v383_v27, %v389_v36  ;;  %v577_v27 = vsel %vm299_vm0, %v360_v25, 0 }
 0x291   : > { %586 = vmatpush.bf16.msra.mxu1 %v577_v27 }
 0x292   : > { %v391_v38 = vmul.f32 1.442695, %v390_v37 }
 0x294   : > { %881 = vpow2.f32 %v391_v38 }
 0x29a   : > { %v882_v39 = vpop.eup %881 }
 0x29b   : > { %v393_v40 = vsel %vm367_vm3, %v882_v39, 0.0 }
 0x29c   : > { %394 = vadd.xlane.f32.xlu1 %v393_v40 }
 0x2b5   : > { %399 = vrot.lane.b32.xlu1 %v1064_v11, %s979_s28 }
 0x2bd   : > { %516 = vrot.lane.b32.xlu1 %v1064_v11, %s980_s29 }
 0x2f1   : > { %v452_v3 = vpop.xlane.xlu0 %451 }
 0x30f   : > { %v395_v41 = vpop.xlane.xlu1 %394 }
 0x310   : > { %883 = vrcp.f32 %v395_v41 }
 0x316   : > { %v884_v42 = vpop.eup %883 }
 0x317   : > { %v397_v43 = vmul.f32 %v884_v42, %v882_v39 }
 0x319   : > { %v398_v46 = vpack.c.bf16 %v397_v43, %v397_v43 }
 0x327   : > { %v400_v44 = vpop.permute.xlu1 %399 }
 0x328   : > { %v405_v45 = vsel %vm299_vm0, %v400_v44, 0 }
 0x329   : > { %414 = vmatpush.bf16.msra.mxu3 %v405_v45 }
 0x32c   : > { %823 = vmatmul.msk.bf16.vlgmr.msra.gmra.mxu3 %vm367_vm3, %v398_v46 }
 0x32f   : > { %v517_v47 = vpop.permute.xlu1 %516 }
 0x330   : > { %828 = vmatmul.msk.bf16.vlgmr.msra.gmra.mxu0 %vm367_vm3, %v517_v47 }
 0x3ad   : > { %v535_v48 = vpop.f32.mrf.mxu0 }
 0x3ae   : > { %v539_v49 = vsel %vm367_vm3, %v535_v48, -inf }
 0x3af   : > { %v416_v50 = vpop.f32.mrf.mxu3  ;;  %540 = vmax.xlane.f32.xlu1 %v539_v49 }
 0x3b0   : > { %v420_v51 = vpack.c.bf16 %v416_v50, %v416_v50 }
 0x3b2   : > { %827 = vmatmul.msk.bf16.vlgmr.msrb.gmra.mxu2 %vm367_vm3, %v420_v51 }
 0x3b5   : > { %v537_v52 = vpop.f32.mrf.mxu0 }
 0x3b7   : > { %v418_v53 = vpop.f32.mrf.mxu3 }
 0x3c2   : > { %831 = vmatmul.msk.bf16.vlgmr.msra.gmra.mxu2 %vm367_vm3, %v594_v30 }
 0x422   : > { %v541_v54 = vpop.xlane.xlu1 %540 }
 0x423   : > { %v542_v55 = vsub.f32 %v535_v48, %v541_v54 }
 0x425   : > { %v543_v56 = vmul.f32 1.442695, %v542_v55 }
 0x427   : > { %885 = vpow2.f32 %v543_v56 }
 0x42d   : > { %v886_v57 = vpop.eup %885 }
 0x42e   : > { %v545_v58 = vsel %vm367_vm3, %v886_v57, 0.0 }
 0x42f   : > { %546 = vadd.xlane.f32.xlu2 %v545_v58 }
 0x435   : > { %v1098_v59 = vpop.f32.mrf.mxu2 }
 0x43d   : > { %v514_v60 = vpop.f32.mrf.mxu2 }
 0x445   : > { %v612_v61 = vpop.f32.mrf.mxu2 }
 0x446   : > { %v616_v62 = vsel %vm367_vm3, %v612_v61, -inf }
 0x447   : > { %628 = vrot.lane.b32.xlu2 %v1064_v11, %s981_s30  ;;  %617 = vmax.xlane.f32.xlu0 %v616_v62 }
 0x44d   : > { %v614_v63 = vpop.f32.mrf.mxu2 }
 0x45b   : > { %456 = vrot.lane.b32.xlu0 %v1064_v11, %s982_s7 }
 0x463   : > { %551 = vrot.lane.b32.xlu0 %v1064_v11, %s983_s8 }
 0x4a2   : > { %v547_v0 = vpop.xlane.xlu2 %546 }
 0x4aa   : > { %v629_v1 = vpop.permute.xlu2 %628 }
 0x4ab   : > { %v634_v2 = vsel %vm299_vm0, %v629_v1, 0 }
 0x4ac   : > { %643 = vmatpush.bf16.msrb.mxu0 %v634_v2 }
 0x4ba   : > { %v618_v4 = vpop.xlane.xlu0 %617 }
 0x4bb   : > { %v619_v5 = vsub.f32 %v612_v61, %v618_v4 }
 0x4bd   : > { %v620_v7 = vmul.f32 1.442695, %v619_v5 }
 0x4bf   : > { %887 = vpow2.f32 %v620_v7 }
 0x4c0   : > { %889 = vrcp.f32 %v452_v3 }
 0x4c1   : > { %891 = vrcp.f32 %v547_v0 }
 0x4c5   : > { %v888_v8 = vpop.eup %887 }
 0x4c6   : > { %v622_v9 = vsel %vm367_vm3, %v888_v8, 0.0  ;;  %v890_v10 = vpop.eup %889 }
 0x4c7   : > { %623 = vadd.xlane.f32.xlu1 %v622_v9  ;;  %v454_v12 = vmul.f32 %v890_v10, %v1084_v34  ;;  %v892_v17 = vpop.eup %891 }
 0x4c8   : > { %v549_v18 = vmul.f32 %v892_v17, %v886_v57 }
 0x4c9   : > { %v455_v14 = vpack.c.bf16 %v454_v12, %v454_v12 }
 0x4ca   : > { %v550_v19 = vpack.c.bf16 %v549_v18, %v549_v18 }
 0x4cd   : > { %v457_v13 = vpop.permute.xlu0 %456 }
 0x4ce   : > { %v462_v11 = vsel %vm299_vm0, %v457_v13, 0 }
 0x4cf   : > { %471 = vmatpush.bf16.msrb.mxu3 %v462_v11 }
 0x4d2   : > { %825 = vmatmul.msk.bf16.vlgmr.msrb.gmra.mxu3 %vm367_vm3, %v455_v14 }
 0x4d5   : > { %v552_v15 = vpop.permute.xlu0 %551 }
 0x4d6   : > { %v557_v16 = vsel %vm299_vm0, %v552_v15, 0 }
 0x4d7   : > { %566 = vmatpush.bf16.msra.mxu3 %v557_v16 }
 0x4db   : > { %663 = vmatpush.bf16.msrb.mxu3 %v654_v29 }
 0x4e2   : > { %829 = vmatmul.msk.bf16.vlgmr.msra.gmra.mxu3 %vm367_vm3, %v550_v19 }
 0x53a   : > { %v624_v22 = vpop.xlane.xlu1 %623 }
 0x53b   : > { %893 = vrcp.f32 %v624_v22 }
 0x541   : > { %v894_v23 = vpop.eup %893 }
 0x542   : > { %v626_v24 = vmul.f32 %v894_v23, %v888_v8 }
 0x544   : > { %v627_v26 = vpack.c.bf16 %v626_v24, %v626_v24 }
 0x546   : > { %832 = vmatmul.msk.bf16.vlgmr.msrb.gmra.mxu0 %vm367_vm3, %v627_v26 }
 0x555   : > { %v473_v30 = vpop.f32.mrf.mxu3 }
 0x556   : > { %v477_v31 = vpack.c.bf16 %v473_v30, %v473_v30 }
 0x558   : > { %826 = vmatmul.msk.bf16.vlgmr.msrb.gmra.mxu1 %vm367_vm3, %v477_v31 }
 0x55d   : > { %v475_v32 = vpop.f32.mrf.mxu3 }
 0x565   : > { %v568_v33 = vpop.f32.mrf.mxu3 }
 0x566   : > { %v572_v34 = vpack.c.bf16 %v568_v33, %v568_v33 }
 0x568   : > { %830 = vmatmul.msk.bf16.vlgmr.msra.gmra.mxu1 %vm367_vm3, %v572_v34 }
 0x56d   : > { %v570_v35 = vpop.f32.mrf.mxu3 }
 0x5c3   : > { %v645_v36 = vpop.f32.mrf.mxu0 }
 0x5c4   : > { %v649_v37 = vpack.c.bf16 %v645_v36, %v645_v36 }
 0x5c6   : > { %833 = vmatmul.msk.bf16.vlgmr.msrb.gmra.mxu3 %vm367_vm3, %v649_v37 }
 0x5cb   : > { %v647_v38 = vpop.f32.mrf.mxu0 }
 0x5d5   : > { %v493_v39 = vpop.f32.mrf.mxu1 }
 0x5d6   : > { %v513_v41 = vadd.f32 %v1098_v59, %v493_v39 }
 0x5dd   : > { %v495_v40 = vpop.f32.mrf.mxu1 }
 0x5e5   : > { %v588_v42 = vpop.f32.mrf.mxu1 }
 0x5e6   : > { %v592_v43 = vadd.f32 %v588_v42, %v513_v41 }
 0x5ed   : > { %v590_v44 = vpop.f32.mrf.mxu1 }
 0x649   : > { %v665_v45 = vpop.f32.mrf.mxu3 }
 0x64a   : > { %v669_v46 = vadd.f32 %v665_v45, %v592_v43 }
 0x64c   : > { %v670_v47 = vadd.f32 %v669_v46, %v1059_v6 }
 0x64e   : > { %v671_v48 = vpack.c.bf16 %v670_v47, %v670_v47  ;;  %v674_v49 = vsel %vm340_vm2, %v670_v47, 0.0  ;;  %v681_v50 = vmul.f32 %v670_v47, %v670_v47 }
 0x64f   : > { %v675_v51 = vrot.slane %v674_v49, 4 }
 0x650   : > { %673 = vst.msk [vmem:[%s283_s18] sm:$0xf] %vm672_vm4, %v671_v48  ;;  %v682_v52 = vsel %vm340_vm2, %v681_v50, 0.0 }
 0x651   : > { %v676_v53 = vadd.f32 %v675_v51, %v674_v49  ;;  %v683_v54 = vrot.slane %v682_v52, 4  ;;  %v667_v55 = vpop.f32.mrf.mxu3 }
 0x653   : > { %v677_v56 = vrot.slane %v676_v53, 2  ;;  %v684_v57 = vadd.f32 %v683_v54, %v682_v52 }
 0x655   : > { %v678_v6 = vadd.f32 %v677_v56, %v676_v53  ;;  %v685_v58 = vrot.slane %v684_v57, 2 }
 0x657   : > { %v679_v59 = vrot.slane %v678_v6, 1  ;;  %v686_v60 = vadd.f32 %v685_v58, %v684_v57 }
 0x659   : > { %v687_v61 = vrot.slane %v686_v60, 1  ;;  %v680_v62 = vadd.f32 %v679_v59, %v678_v6 }
 0x65b   : > { %v688_v63 = vadd.f32 %v687_v61, %v686_v60 }
 0x65d   : > { %v690_v0 = vsel %vm689_vm5, %v680_v62, %v688_v63 }
 0x65e   : > { %692 = vst.msk [vmem:[%s287_s23] sm:$0x3] %vm691_vm6, %v690_v0 }
 0x65f PF: > { %s19_s21 = sadd.s32 1, %s969_s21  }
 0x660   : > { %p16_p7 = scmp.ge.s32.totalorder %s19_s21, 4  }
 0x662   :  { %18 = sbr.rel (!%p16_p7) target bundleno = 2 (0x2), region = 91 }
 0x667   :  { %726 = vsyncpa [#allocation3], 1 }
 0x668   :  { %728 = vsyncpa [#allocation3 + $0x1], 1 }
 0x669   :  { %729 = vsyncpa [#allocation5], 1 }

// kernel: graph_attention_encoder.7
= control target key start
LH: loop header
LB: loop body
LE: loop exit
PB: predicated region body
PF: predicated region fallthrough
CT: control target
= control target key end

     0   :  { %s850_s21 = smov 0   ;;  %s959_s0 = inlined_call_operand.vmem [shape: bf16[2,8,32], index: 0, kind: input, shape index: {}]   ;;  %s960_s1 = inlined_call_operand.vmem [shape: f32[1,32], index: 1, kind: input, shape index: {}]   ;;  %s961_s2 = inlined_call_operand.vmem [shape: f32[1,32], index: 2, kind: input, shape index: {}]   ;;  %s962_s3 = inlined_call_operand.vmem [shape: bf16[32,96], index: 3, kind: input, shape index: {}]   ;;  %s963_s4 = inlined_call_operand.vmem [shape: bf16[4,8,32], index: 4, kind: input, shape index: {}]   ;;  %s964_s5 = inlined_call_operand.vmem [shape: bf16[2,8,32], index: 5, kind: output, shape index: {0}]   ;;  %s965_s6 = inlined_call_operand.vmem [shape: f32[2,2,32], index: 6, kind: output, shape index: {1}]  }
   0x1 LB: > { %s726_s22 = sadd.s32 4294967295, %s802_s21   ;;  %p730_p0 = scmp.ge.s32.totalorder %s802_s21, 1  ;;  %s802_s21 = sphi %s850_s21, %s17_s21  }
   0x2   : > { %p214_p1 = scmp.lt.s32.totalorder %s802_s21, 3 }
   0x4   : > { %p215_p2 = pnand %p730_p0, %p214_p1 }
   0x5   : > { %p246_p3 = scmp.lt.s32.totalorder (!%p215_p2), %s726_s22, 1  ;;  %s804_s11 = smov (!%p215_p2), 88  }
   0x6   : > { %218 = sbr.rel (%p215_p2) target bundleno = 1496 (0x5d8), region = 40  ;;  %s805_s12 = smov (!%p215_p2), 96  }
   0x7   : > { %s806_s13 = smov (!%p215_p2), 120   ;;  %s807_s14 = smov (!%p215_p2), 80  }
   0x8   : > { %s808_s15 = smov (!%p215_p2), 72   ;;  %s809_s16 = smov (!%p215_p2), 112  }
   0x9   : > { %s810_s19 = smov (!%p215_p2), 56   ;;  %s811_s20 = smov (!%p215_p2), 40  }
   0xa   : > { %s812_s23 = smov (!%p215_p2), 64   ;;  %s813_s24 = smov (!%p215_p2), 104  }
   0xb   : > { %v758_v0 = vld [vmem:[%s962_s3 + $0x8] sm:$0xff]  ;;  %v757_v1 = vld [vmem:[%s962_s3] sm:$0xff]  ;;  %s967_s22 = smov (!%p246_p3, %s726_s22), 1  ;;  %vm288_vm0 = vcmask 261120   ;;  %vm315_vm1 = vcmask 64512   ;;  %vm352_vm2 = vcmask 1043456  }
   0xc   : > { %298 = vmatpush.bf16.msra.mxu0 %v758_v0  ;;  %s731_s27 = sshll.u32 %s967_s22, 2  ;;  %v778_v2 = vld [vmem:[%s960_s1] ss:$0 sm:$0xff]  ;;  %v307_v60 = vld [vmem:[%s963_s4 + $0x4] sm:$0xf]  ;;  %s814_s28 = smov 48  }
   0xd   : > { %s249_s30 = scalar_lea.vmem %s959_s0, %s731_s27  ;;  %v779_v5 = vld [vmem:[%s961_s2] ss:$0 sm:$0xff]  ;;  %v431_v61 = vsel %vm352_vm2, %v307_v60, 0  ;;  %vm621_vm3 = vcmask 257024   ;;  %vm638_vm4 = vcmask 1040384   ;;  %vm640_vm5 = vcmask 254976  }
   0xe   : > { %v259_v3 = vld [vmem:[%s249_s30] sm:$0xf] }
   0xf   : > { %v260_v4 = vunpack.c.l.bf16 %v259_v3  ;;  %v306_v19 = vld [vmem:[%s963_s4] sm:$0xf] }
  0x10   : > { %299 = vmatpush.bf16.msra.mxu0 %v757_v1  ;;  %v450_v22 = vsel %vm352_vm2, %v306_v19, 0 }
  0x11   : > { %v265_v6 = vmul.f32 %v778_v2, %v260_v4 }
  0x13   : > { %v878_v7 = vadd.f32 %v779_v5, %v265_v6 }
  0x14   : > { %440 = vmatpush.bf16.msrb.mxu0 %v431_v61 }
  0x15   : > { %v275_v8 = vpack.c.bf16 %v878_v7, %v878_v7 }
  0x17   : > { %742 = vmatmul.msk.bf16.vlgmr.msra.gmra.mxu0 %vm288_vm0, %v275_v8 }
  0x94   : > { %v301_v9 = vpop.f32.mrf.mxu0 }
  0x95   : > { %v305_v10 = vpack.c.bf16 %v301_v9, %v301_v9 }
  0x97   : > { %v311_v11 = vunpack.c.l.b16 %v305_v10 }
  0x99   : > { %v883_v12 = vpack.c.b16 %v311_v11, %v311_v11 }
  0x9b   : > { %372 = vrot.lane.b32.xlu2 %v883_v12, %s804_s11  ;;  %313 = vrot.lane.b32.xlu0 %v883_v12, %s805_s12  ;;  %s253_s11 = scalar_lea.vmem %s964_s5, %s731_s27  ;;  %s733_s27 = sshll.u32 %s967_s22, 1 }
  0x9c   : > { %v303_v13 = vpop.f32.mrf.mxu0 }
  0xa3   : > { %370 = vrot.lane.b32.xlu2 %v883_v12, %s806_s13 }
  0xab   : > { %467 = vrot.lane.b32.xlu2 %v883_v12, %s807_s14  ;;  %s257_s14 = scalar_lea.vmem %s965_s6, %s733_s27 }
  0xb3   : > { %544 = vrot.lane.b32.xlu2 %v883_v12, %s808_s15 }
  0xbb   : > { %465 = vrot.lane.b32.xlu2 %v883_v12, %s809_s16 }
  0xf5   : > { %v373_v14 = vpop.permute.xlu2 %372 }
  0xf6   : > { %v378_v15 = vsel %vm315_vm1, %v373_v14, 0 }
  0xf7   : > { %387 = vmatpush.bf16.xpose.msra.mxu3 %v378_v15 }
  0xfd   : > { %v371_v16 = vpop.permute.xlu2 %370 }
  0xfe   : > { %745 = vmatmul.msk.bf16.vlgmr.msra.gmra.mxu3 %vm315_vm1, %v371_v16 }
 0x105   : > { %v468_v17 = vpop.permute.xlu2 %467 }
 0x106   : > { %v473_v18 = vsel %vm315_vm1, %v468_v17, 0 }
 0x107   : > { %482 = vmatpush.bf16.xpose.msrb.mxu3 %v473_v18 }
 0x10d   : > { %v545_v20 = vpop.permute.xlu2 %544  ;;  %v314_v21 = vpop.permute.xlu0 %313 }
 0x10e   : > { %v320_v23 = vsel %vm315_vm1, %v314_v21, 0  ;;  %v550_v25 = vsel %vm315_vm1, %v545_v20, 0 }
 0x10f   : > { %329 = vmatpush.bf16.xpose.msra.mxu1 %v320_v23 }
 0x115   : > { %v466_v24 = vpop.permute.xlu2 %465 }
 0x116   : > { %743 = vmatmul.msk.bf16.vlgmr.msra.gmra.mxu1 %vm315_vm1, %v305_v10  ;;  %749 = vmatmul.msk.bf16.vlgmr.msrb.gmra.mxu3 %vm315_vm1, %v466_v24 }
 0x117   : > { %459 = vmatpush.bf16.msrb.mxu1 %v450_v22 }
 0x11b   : > { %559 = vmatpush.bf16.xpose.msra.mxu1 %v550_v25 }
 0x181   : > { %v389_v26 = vpop.f32.mrf.mxu3 }
 0x182   : > { %v393_v27 = vsel %vm315_vm1, %v389_v26, -inf }
 0x183   : > { %394 = vmax.xlane.f32.xlu2 %v393_v27  ;;  %v309_v27 = vld [vmem:[%s963_s4 + $0xc] sm:$0xf] }
 0x189   : > { %v391_v28 = vpop.f32.mrf.mxu3 }
 0x193   : > { %v331_v29 = vpop.f32.mrf.mxu1 }
 0x194   : > { %v335_v30 = vsel %vm315_vm1, %v331_v29, -inf }
 0x195   : > { %336 = vmax.xlane.f32.xlu0 %v335_v30 }
 0x199   : > { %v904_v31 = vpop.f32.mrf.mxu3 }
 0x19a   : > { %v488_v33 = vsel %vm315_vm1, %v904_v31, -inf }
 0x19b   : > { %v333_v32 = vpop.f32.mrf.mxu1 }
 0x19c   : > { %v603_v32 = vsel %vm352_vm2, %v309_v27, 0 }
 0x19d   : > { %489 = vmax.xlane.f32.xlu0 %v488_v33 }
 0x1a1   : > { %v486_v34 = vpop.f32.mrf.mxu3 }
 0x1f6   : > { %v395_v35 = vpop.xlane.xlu2 %394 }
 0x1f7   : > { %v396_v36 = vsub.f32 %v389_v26, %v395_v35  ;;  %v308_v35 = vld [vmem:[%s963_s4 + $0x8] sm:$0xf] }
 0x1f9   : > { %v397_v37 = vmul.f32 1.442695, %v396_v36  ;;  %v526_v36 = vsel %vm352_vm2, %v308_v35, 0 }
 0x1fa   : > { %535 = vmatpush.bf16.msra.mxu0 %v526_v36 }
 0x1fb   : > { %780 = vpow2.f32 %v397_v37 }
 0x201   : > { %v781_v38 = vpop.eup %780 }
 0x202   : > { %v399_v39 = vsel %vm315_vm1, %v781_v38, 0.0 }
 0x203   : > { %400 = vadd.xlane.f32.xlu0 %v399_v39 }
 0x208   : > { %v337_v40 = vpop.xlane.xlu0 %336 }
 0x209   : > { %v338_v41 = vsub.f32 %v331_v29, %v337_v40 }
 0x20b   : > { %v339_v42 = vmul.f32 1.442695, %v338_v41 }
 0x20d   : > { %782 = vpow2.f32 %v339_v42 }
 0x210   : > { %v490_v45 = vpop.xlane.xlu0 %489 }
 0x211   : > { %v491_v6 = vsub.f32 %v904_v31, %v490_v45 }
 0x213   : > { %v783_v43 = vpop.eup %782  ;;  %v492_v9 = vmul.f32 1.442695, %v491_v6 }
 0x214   : > { %v341_v44 = vsel %vm315_vm1, %v783_v43, 0.0 }
 0x215   : > { %342 = vadd.xlane.f32.xlu1 %v341_v44 }
 0x217   : > { %405 = vrot.lane.b32.xlu0 %v883_v12, %s810_s19 }
 0x21f   : > { %577 = vrot.lane.b32.xlu0 %v883_v12, %s811_s20 }
 0x22e   : > { %347 = vrot.lane.b32.xlu1 %v883_v12, %s812_s23 }
 0x236   : > { %542 = vrot.lane.b32.xlu1 %v883_v12, %s813_s24 }
 0x276   : > { %v401_v46 = vpop.xlane.xlu0 %400 }
 0x288   : > { %v343_v50 = vpop.xlane.xlu1 %342 }
 0x289   : > { %v406_v47 = vpop.permute.xlu0 %405  ;;  %784 = vrcp.f32 %v343_v50 }
 0x28a   : > { %v411_v55 = vsel %vm352_vm2, %v406_v47, 0  ;;  %786 = vrcp.f32 %v401_v46 }
 0x28b   : > { %788 = vpow2.f32 %v492_v9 }
 0x28f   : > { %v785_v51 = vpop.eup %784 }
 0x290   : > { %v345_v52 = vmul.f32 %v785_v51, %v783_v43  ;;  %v787_v57 = vpop.eup %786 }
 0x291   : > { %v578_v48 = vpop.permute.xlu0 %577  ;;  %v403_v58 = vmul.f32 %v787_v57, %v781_v38  ;;  %v789_v15 = vpop.eup %788 }
 0x292   : > { %v583_v49 = vsel %vm352_vm2, %v578_v48, 0  ;;  %v346_v56 = vpack.c.bf16 %v345_v52, %v345_v52  ;;  %v494_v18 = vsel %vm315_vm1, %v789_v15, 0.0 }
 0x293   : > { %592 = vmatpush.bf16.msra.mxu3 %v583_v49  ;;  %v404_v59 = vpack.c.bf16 %v403_v58, %v403_v58 }
 0x2a0   : > { %v348_v53 = vpop.permute.xlu1 %347 }
 0x2a1   : > { %v354_v54 = vsel %vm352_vm2, %v348_v53, 0 }
 0x2a2   : > { %363 = vmatpush.bf16.msra.mxu2 %v354_v54 }
 0x2a5   : > { %744 = vmatmul.msk.bf16.vlgmr.msra.gmra.mxu2 %vm315_vm1, %v346_v56 }
 0x2a6   : > { %420 = vmatpush.bf16.msrb.mxu2 %v411_v55 }
 0x2a8   : > { %v543_v3 = vpop.permute.xlu1 %542 }
 0x2b5   : > { %746 = vmatmul.msk.bf16.vlgmr.msrb.gmra.mxu2 %vm315_vm1, %v404_v59 }
 0x328   : > { %v365_v62 = vpop.f32.mrf.mxu2 }
 0x329   : > { %v369_v63 = vpack.c.bf16 %v365_v62, %v365_v62 }
 0x32b   : > { %748 = vmatmul.msk.bf16.vlgmr.msrb.gmra.mxu1 %vm315_vm1, %v369_v63 }
 0x330   : > { %v367_v0 = vpop.f32.mrf.mxu2 }
 0x338   : > { %v422_v1 = vpop.f32.mrf.mxu2 }
 0x339   : > { %v426_v2 = vpack.c.bf16 %v422_v1, %v422_v1 }
 0x33b   : > { %747 = vmatmul.msk.bf16.vlgmr.msrb.gmra.mxu0 %vm315_vm1, %v426_v2  ;;  %752 = vmatmul.msk.bf16.vlgmr.msra.gmra.mxu1 %vm315_vm1, %v543_v3 }
 0x340   : > { %v424_v4 = vpop.f32.mrf.mxu2 }
 0x3a8   : > { %v461_v5 = vpop.f32.mrf.mxu1 }
 0x3b0   : > { %v463_v8 = vpop.f32.mrf.mxu1 }
 0x3b8   : > { %v442_v10 = vpop.f32.mrf.mxu0  ;;  %v561_v11 = vpop.f32.mrf.mxu1 }
 0x3b9   : > { %v462_v13 = vadd.f32 %v461_v5, %v442_v10  ;;  %v565_v14 = vsel %vm315_vm1, %v561_v11, -inf }
 0x3ba   : > { %566 = vmax.xlane.f32.xlu1 %v565_v14 }
 0x3c0   : > { %v444_v16 = vpop.f32.mrf.mxu0  ;;  %v563_v17 = vpop.f32.mrf.mxu1 }
 0x3c2   : > { %495 = vadd.xlane.f32.xlu1 %v494_v18 }
 0x42d   : > { %v567_v19 = vpop.xlane.xlu1 %566 }
 0x42e   : > { %v568_v20 = vsub.f32 %v561_v11, %v567_v19 }
 0x430   : > { %v569_v21 = vmul.f32 1.442695, %v568_v20 }
 0x432   : > { %790 = vpow2.f32 %v569_v21 }
 0x435   : > { %v496_v24 = vpop.xlane.xlu1 %495 }
 0x436   : > { %792 = vrcp.f32 %v496_v24 }
 0x438   : > { %v791_v22 = vpop.eup %790 }
 0x439   : > { %v571_v23 = vsel %vm315_vm1, %v791_v22, 0.0 }
 0x43a   : > { %572 = vadd.xlane.f32.xlu2 %v571_v23 }
 0x43c   : > { %v793_v26 = vpop.eup %792 }
 0x43d   : > { %v498_v29 = vmul.f32 %v793_v26, %v789_v15 }
 0x452   : > { %500 = vrot.lane.b32.xlu2 %v883_v12, %s814_s28  ;;  %v499_v12 = vpack.c.bf16 %v498_v29, %v498_v29 }
 0x4ad   : > { %v573_v25 = vpop.xlane.xlu2 %572 }
 0x4ae   : > { %794 = vrcp.f32 %v573_v25 }
 0x4b4   : > { %v795_v28 = vpop.eup %794 }
 0x4b5   : > { %v575_v30 = vmul.f32 %v795_v28, %v791_v22  ;;  %v501_v31 = vpop.permute.xlu2 %500 }
 0x4b6   : > { %v506_v33 = vsel %vm352_vm2, %v501_v31, 0 }
 0x4b7   : > { %v576_v34 = vpack.c.bf16 %v575_v30, %v575_v30  ;;  %515 = vmatpush.bf16.msra.mxu2 %v506_v33 }
 0x4b9   : > { %753 = vmatmul.msk.bf16.vlgmr.msra.gmra.mxu3 %vm315_vm1, %v576_v34 }
 0x4ba   : > { %750 = vmatmul.msk.bf16.vlgmr.msra.gmra.mxu2 %vm315_vm1, %v499_v12 }
 0x4bb   : > { %612 = vmatpush.bf16.msrb.mxu2 %v603_v32 }
 0x53c   : > { %v594_v37 = vpop.f32.mrf.mxu3 }
 0x53d   : > { %v598_v38 = vpack.c.bf16 %v594_v37, %v594_v37  ;;  %v517_v39 = vpop.f32.mrf.mxu2 }
 0x53e   : > { %v521_v40 = vpack.c.bf16 %v517_v39, %v517_v39 }
 0x53f   : > { %754 = vmatmul.msk.bf16.vlgmr.msrb.gmra.mxu2 %vm315_vm1, %v598_v38 }
 0x540   : > { %751 = vmatmul.msk.bf16.vlgmr.msra.gmra.mxu0 %vm315_vm1, %v521_v40 }
 0x544   : > { %v596_v41 = vpop.f32.mrf.mxu3 }
 0x545   : > { %v519_v42 = vpop.f32.mrf.mxu2 }
 0x5bd   : > { %v537_v43 = vpop.f32.mrf.mxu0 }
 0x5be   : > { %v541_v44 = vadd.f32 %v537_v43, %v462_v13 }
 0x5c2   : > { %v614_v45 = vpop.f32.mrf.mxu2 }
 0x5c3   : > { %v618_v46 = vadd.f32 %v614_v45, %v541_v44 }
 0x5c5   : > { %v619_v47 = vadd.f32 %v618_v46, %v878_v7  ;;  %v539_v48 = vpop.f32.mrf.mxu0 }
 0x5c7   : > { %v620_v49 = vpack.c.bf16 %v619_v47, %v619_v47  ;;  %v623_v50 = vsel %vm288_vm0, %v619_v47, 0.0  ;;  %v630_v51 = vmul.f32 %v619_v47, %v619_v47 }
 0x5c8   : > { %v624_v52 = vrot.slane %v623_v50, 4 }
 0x5c9   : > { %622 = vst.msk [vmem:[%s253_s11] sm:$0xf] %vm621_vm3, %v620_v49  ;;  %v631_v53 = vsel %vm288_vm0, %v630_v51, 0.0 }
 0x5ca   : > { %v625_v54 = vadd.f32 %v624_v52, %v623_v50  ;;  %v632_v55 = vrot.slane %v631_v53, 4  ;;  %v616_v56 = vpop.f32.mrf.mxu2 }
 0x5cc   : > { %v626_v7 = vrot.slane %v625_v54, 2  ;;  %v633_v57 = vadd.f32 %v632_v55, %v631_v53 }
 0x5ce   : > { %v627_v58 = vadd.f32 %v626_v7, %v625_v54  ;;  %v634_v59 = vrot.slane %v633_v57, 2 }
 0x5d0   : > { %v628_v60 = vrot.slane %v627_v58, 1  ;;  %v635_v61 = vadd.f32 %v634_v59, %v633_v57 }
 0x5d2   : > { %v636_v62 = vrot.slane %v635_v61, 1  ;;  %v629_v63 = vadd.f32 %v628_v60, %v627_v58 }
 0x5d4   : > { %v637_v0 = vadd.f32 %v636_v62, %v635_v61 }
 0x5d6   : > { %v639_v1 = vsel %vm638_vm4, %v629_v63, %v637_v0 }
 0x5d7   : > { %641 = vst.msk [vmem:[%s257_s14] sm:$0x3] %vm640_vm5, %v639_v1 }
 0x5d8 PF: > { %s17_s21 = sadd.s32 1, %s802_s21  }
 0x5d9   : > { %p14_p4 = scmp.ge.s32.totalorder %s17_s21, 4  }
 0x5db   :  { %16 = sbr.rel (!%p14_p4) target bundleno = 1 (0x1), region = 82 }

</bundles_post_ra>
